<compile_context>
chip_gen: v5e
topology: v5e:2x2
jax: 0.10.0
libtpu: 0.0.40
codegen_flags: <defaults>
</compile_context>

<pallas_src>
import functools

import jax
import jax.numpy as jnp
from jax.experimental import pallas as pl
from jax.experimental.pallas import tpu as pltpu


def _layer_norm(x, w, b, eps=1e-5):
    # PyTorch LayerNorm over last dim, biased variance, eps=1e-5 (f32 math)
    mean = jnp.mean(x, axis=-1, keepdims=True)
    var = jnp.mean((x - mean) ** 2, axis=-1, keepdims=True)
    return (x - mean) * jax.lax.rsqrt(var + eps) * w + b


def _encoder_layer_kernel(
    x_q_ref, x_full_ref,
    wq_ref, bq_ref, wk_ref, bk_ref, wv_ref, bv_ref, wo_ref, bo_ref,
    ln1_w_ref, ln1_b_ref,
    w1_ref, b1_ref, w2_ref, b2_ref,
    ln2_w_ref, ln2_b_ref,
    out_ref,
    k_cache_ref, v_cache_ref,
    *, n_heads,
):
    qi = pl.program_id(1)

    x_q = x_q_ref[0]                      # (tq, D) f32
    tq, D = x_q.shape
    H = n_heads
    dh = D // H
    scale = 1.0 / float(dh) ** 0.5

    # ---- project K/V for the whole sequence once per batch element ----
    @pl.when(qi == 0)
    def _():
        x_full = x_full_ref[0].astype(jnp.bfloat16)        # (S, D)
        for h in range(H):                                 # static unroll
            k_h = jnp.dot(x_full, wk_ref[h],
                          preferred_element_type=jnp.float32) + bk_ref[h]
            v_h = jnp.dot(x_full, wv_ref[h],
                          preferred_element_type=jnp.float32) + bv_ref[h]
            k_cache_ref[h] = k_h.astype(jnp.bfloat16)
            v_cache_ref[h] = v_h.astype(jnp.bfloat16)

    # ---- multi-head self attention for this query tile ----
    x_q_bf = x_q.astype(jnp.bfloat16)
    o_acc = jnp.zeros((tq, D), jnp.float32)
    for h in range(H):                                     # static unroll
        q_h = (jnp.dot(x_q_bf, wq_ref[h],
                       preferred_element_type=jnp.float32) + bq_ref[h]) * scale
        k_h = k_cache_ref[h]                               # (S, dh) bf16
        v_h = v_cache_ref[h]                               # (S, dh) bf16
        # scores: contract head dims directly (no explicit transpose / XLU)
        s = jax.lax.dot_general(
            q_h.astype(jnp.bfloat16), k_h,
            dimension_numbers=(((1,), (1,)), ((), ())),
            preferred_element_type=jnp.float32)            # (tq, S) f32
        s = s - jnp.max(s, axis=-1, keepdims=True)
        p = jnp.exp(s)
        p = p * pl.reciprocal(jnp.sum(p, axis=-1, keepdims=True), approx=True)
        ctx = jnp.dot(p.astype(jnp.bfloat16), v_h,
                      preferred_element_type=jnp.float32)  # (tq, dh)
        # this head's slice of the output projection, accumulated (no concat)
        o_acc = o_acc + jnp.dot(ctx.astype(jnp.bfloat16), wo_ref[h],
                                preferred_element_type=jnp.float32)
    attn = o_acc + bo_ref[...]

    # TODO(synk): dropout is identity (eval mode); src_mask not supported.
    y = x_q + attn
    y = _layer_norm(y, ln1_w_ref[...], ln1_b_ref[...])

    # ---- position-wise feed forward ----
    h1 = jnp.dot(y.astype(jnp.bfloat16), w1_ref[...],
                 preferred_element_type=jnp.float32) + b1_ref[...]
    h1 = jnp.maximum(h1, 0.0)
    ff = jnp.dot(h1.astype(jnp.bfloat16), w2_ref[...],
                 preferred_element_type=jnp.float32) + b2_ref[...]

    z = _layer_norm(y + ff, ln2_w_ref[...], ln2_b_ref[...])
    out_ref[0] = z.astype(out_ref.dtype)


def _pick_tq(S, max_tq=256):
    for t in (max_tq, 128, 64, 32, 16, 8):
        if t <= S and S % t == 0:
            return t
    return S


def base_transformer_layer(x, params, n_heads, *, max_tq=256):
    """x: (B, S, D) float32.  params: dict of weights (see init_params)."""
    B, S, D = x.shape
    F = params["w1"].shape[1]
    H = n_heads
    assert D % H == 0, "d_model must be divisible by n_heads"
    dh = D // H

    tq = _pick_tq(S, max_tq)
    num_q = (S + tq - 1) // tq

    bf16 = jnp.bfloat16

    # head-major weight layouts -> no lane slicing / transposes inside kernel
    def in_heads(w):      # (D, H*dh) -> (H, D, dh)
        return w.reshape(D, H, dh).transpose(1, 0, 2).astype(bf16)

    def bias_heads(b):    # (1, H*dh) -> (H, 1, dh)
        return b.reshape(H, 1, dh).astype(jnp.float32)

    wq = in_heads(params["wq"]); wk = in_heads(params["wk"]); wv = in_heads(params["wv"])
    bq = bias_heads(params["bq"]); bk = bias_heads(params["bk"]); bv = bias_heads(params["bv"])
    wo = params["wo"].reshape(H, dh, D).astype(bf16)      # (H*dh, D) -> (H, dh, D)
    w1 = params["w1"].astype(bf16)
    w2 = params["w2"].astype(bf16)

    def full_spec(shape):
        nd = len(shape)
        return pl.BlockSpec(shape, lambda b, q, _nd=nd: (0,) * _nd)

    in_specs = [
        pl.BlockSpec((1, tq, D), lambda b, q: (b, q, 0)),   # x (query tile)
        pl.BlockSpec((1, S, D), lambda b, q: (b, 0, 0)),    # x (full seq -> K/V)
        full_spec((H, D, dh)), full_spec((H, 1, dh)),       # wq, bq
        full_spec((H, D, dh)), full_spec((H, 1, dh)),       # wk, bk
        full_spec((H, D, dh)), full_spec((H, 1, dh)),       # wv, bv
        full_spec((H, dh, D)), full_spec((1, D)),           # wo, bo
        full_spec((1, D)), full_spec((1, D)),               # ln1 w, b
        full_spec((D, F)), full_spec((1, F)),               # ffn w1, b1
        full_spec((F, D)), full_spec((1, D)),               # ffn w2, b2
        full_spec((1, D)), full_spec((1, D)),               # ln2 w, b
    ]

    flops = int(B * (2 * S * (4 * D * D + 2 * D * F) + 4 * S * S * D))
    cost = pl.CostEstimate(
        flops=flops,
        transcendentals=int(B * H * S * S),
        bytes_accessed=int(2 * B * S * D * 4 + (4 * D * D + 2 * D * F) * 2),
    )

    kernel = functools.partial(_encoder_layer_kernel, n_heads=H)

    return pl.pallas_call(
        kernel,
        out_shape=jax.ShapeDtypeStruct((B, S, D), x.dtype),
        grid_spec=pltpu.PrefetchScalarGridSpec(
            num_scalar_prefetch=0,
            grid=(B, num_q),
            in_specs=in_specs,
            out_specs=pl.BlockSpec((1, tq, D), lambda b, q: (b, q, 0)),
            scratch_shapes=[
                pltpu.VMEM((H, S, dh), jnp.bfloat16),   # K cache (per batch elem)
                pltpu.VMEM((H, S, dh), jnp.bfloat16),   # V cache (per batch elem)
            ],
        ),
        compiler_params=pltpu.CompilerParams(
            # batch parallel (megacore sharding); query-tile axis sequential so
            # the K/V scratch written at q==0 is reused by later tiles.
            dimension_semantics=("parallel", "arbitrary"),
            vmem_limit_bytes=64 * 1024 * 1024,
        ),
        cost_estimate=cost,
    )(
        x, x,
        wq, bq, wk, bk, wv, bv, wo, params["bo"],
        params["ln1_w"], params["ln1_b"],
        w1, params["b1"], w2, params["b2"],
        params["ln2_w"], params["ln2_b"],
    )


def reference_layer(x, params, n_heads):
    """Pure-JAX f32 reference (matches the PyTorch module in eval mode)."""
    B, S, D = x.shape
    H = n_heads
    dh = D // H

    def split_heads(t):   # (B, S, D) -> (B, H, S, dh)
        return t.reshape(B, S, H, dh).transpose(0, 2, 1, 3)

    q = split_heads(x @ params["wq"] + params["bq"])
    k = split_heads(x @ params["wk"] + params["bk"])
    v = split_heads(x @ params["wv"] + params["bv"])
    s = jnp.einsum("bhqd,bhkd->bhqk", q, k) / jnp.sqrt(jnp.float32(dh))
    p = jax.nn.softmax(s, axis=-1)
    ctx = jnp.einsum("bhqk,bhkd->bhqd", p, v).transpose(0, 2, 1, 3).reshape(B, S, D)
    attn = ctx @ params["wo"] + params["bo"]

    def ln(t, w, b, eps=1e-5):
        m = t.mean(-1, keepdims=True)
        var = ((t - m) ** 2).mean(-1, keepdims=True)
        return (t - m) / jnp.sqrt(var + eps) * w + b

    y = ln(x + attn, params["ln1_w"], params["ln1_b"])
    h1 = jnp.maximum(y @ params["w1"] + params["b1"], 0.0)
    ff = h1 @ params["w2"] + params["b2"]
    return ln(y + ff, params["ln2_w"], params["ln2_b"])


def init_params(key, d_model, n_heads, feature_dim):
    ks = jax.random.split(key, 8)
    s = 0.02
    return {
        "wq": jax.random.normal(ks[0], (d_model, d_model), jnp.float32) * s,
        "wk": jax.random.normal(ks[1], (d_model, d_model), jnp.float32) * s,
        "wv": jax.random.normal(ks[2], (d_model, d_model), jnp.float32) * s,
        "wo": jax.random.normal(ks[3], (d_model, d_model), jnp.float32) * s,
        "bq": jnp.zeros((1, d_model), jnp.float32),
        "bk": jnp.zeros((1, d_model), jnp.float32),
        "bv": jnp.zeros((1, d_model), jnp.float32),
        "bo": jnp.zeros((1, d_model), jnp.float32),
        "ln1_w": jnp.ones((1, d_model), jnp.float32),
        "ln1_b": jnp.zeros((1, d_model), jnp.float32),
        "w1": jax.random.normal(ks[4], (d_model, feature_dim), jnp.float32) * s,
        "b1": jnp.zeros((1, feature_dim), jnp.float32),
        "w2": jax.random.normal(ks[5], (feature_dim, d_model), jnp.float32) * s,
        "b2": jnp.zeros((1, d_model), jnp.float32),
        "ln2_w": jnp.ones((1, d_model), jnp.float32),
        "ln2_b": jnp.zeros((1, d_model), jnp.float32),
    }


if __name__ == "__main__":
    B, S = 2, 8
    d_model, n_heads, feature_dim = 32, 4, 64

    key = jax.random.PRNGKey(0)
    k_x, k_p = jax.random.split(key)
    x = jax.random.normal(k_x, (B, S, d_model), jnp.float32)
    params = init_params(k_p, d_model, n_heads, feature_dim)

    out = base_transformer_layer(x, params, n_heads)
    out = jax.block_until_ready(out)
    assert out.shape == (B, S, d_model) and out.dtype == jnp.float32
    assert bool(jnp.all(jnp.isfinite(out)))

    # loose tolerance: kernel uses bf16 matmul operands + approx reciprocal
    ref = reference_layer(x, params, n_heads)
    max_err = float(jnp.max(jnp.abs(out - ref)))
    assert max_err < 1e-1, f"max abs error vs reference: {max_err}"

    print("KERNEL_OK")
</pallas_src>

<mosaic_0001>
module attributes {stable_mosaic.version = 11 : i64} {
  func.func @_encoder_layer_kernel(%arg0: i32, %arg1: i32, %arg2: memref<1x8x32xf32, #tpu.memory_space<vmem>>, %arg3: memref<1x8x32xf32, #tpu.memory_space<vmem>>, %arg4: memref<4x32x8xbf16, #tpu.memory_space<vmem>>, %arg5: memref<4x1x8xf32, #tpu.memory_space<vmem>>, %arg6: memref<4x32x8xbf16, #tpu.memory_space<vmem>>, %arg7: memref<4x1x8xf32, #tpu.memory_space<vmem>>, %arg8: memref<4x32x8xbf16, #tpu.memory_space<vmem>>, %arg9: memref<4x1x8xf32, #tpu.memory_space<vmem>>, %arg10: memref<4x8x32xbf16, #tpu.memory_space<vmem>>, %arg11: memref<1x32xf32, #tpu.memory_space<vmem>>, %arg12: memref<1x32xf32, #tpu.memory_space<vmem>>, %arg13: memref<1x32xf32, #tpu.memory_space<vmem>>, %arg14: memref<32x64xbf16, #tpu.memory_space<vmem>>, %arg15: memref<1x64xf32, #tpu.memory_space<vmem>>, %arg16: memref<64x32xbf16, #tpu.memory_space<vmem>>, %arg17: memref<1x32xf32, #tpu.memory_space<vmem>>, %arg18: memref<1x32xf32, #tpu.memory_space<vmem>>, %arg19: memref<1x32xf32, #tpu.memory_space<vmem>>, %arg20: memref<1x8x32xf32, #tpu.memory_space<vmem>>, %arg21: memref<4x8x8xbf16, #tpu.memory_space<vmem>>, %arg22: memref<4x8x8xbf16, #tpu.memory_space<vmem>>) attributes {dimension_semantics = [#tpu.dimension_semantics<parallel>, #tpu.dimension_semantics<arbitrary>], iteration_bounds = array<i64: 2, 1>, scalar_prefetch = 0 : i64, scratch_operands = 2 : i64, tpu.core_type = #tpu.core_type<tc>, window_params = [{transform_indices = @transform_0, window_bounds = array<i64: 1, 8, 32>}, {transform_indices = @transform_1, window_bounds = array<i64: 1, 8, 32>}, {pipeline_mode = #tpu.pipeline_mode<synchronous>, transform_indices = @transform_2, window_bounds = array<i64: 4, 32, 8>}, {pipeline_mode = #tpu.pipeline_mode<synchronous>, transform_indices = @transform_3, window_bounds = array<i64: 4, 1, 8>}, {pipeline_mode = #tpu.pipeline_mode<synchronous>, transform_indices = @transform_4, window_bounds = array<i64: 4, 32, 8>}, {pipeline_mode = #tpu.pipeline_mode<synchronous>, transform_indices = @transform_5, window_bounds = array<i64: 4, 1, 8>}, {pipeline_mode = #tpu.pipeline_mode<synchronous>, transform_indices = @transform_6, window_bounds = array<i64: 4, 32, 8>}, {pipeline_mode = #tpu.pipeline_mode<synchronous>, transform_indices = @transform_7, window_bounds = array<i64: 4, 1, 8>}, {pipeline_mode = #tpu.pipeline_mode<synchronous>, transform_indices = @transform_8, window_bounds = array<i64: 4, 8, 32>}, {pipeline_mode = #tpu.pipeline_mode<synchronous>, transform_indices = @transform_9, window_bounds = array<i64: 1, 32>}, {pipeline_mode = #tpu.pipeline_mode<synchronous>, transform_indices = @transform_10, window_bounds = array<i64: 1, 32>}, {pipeline_mode = #tpu.pipeline_mode<synchronous>, transform_indices = @transform_11, window_bounds = array<i64: 1, 32>}, {pipeline_mode = #tpu.pipeline_mode<synchronous>, transform_indices = @transform_12, window_bounds = array<i64: 32, 64>}, {pipeline_mode = #tpu.pipeline_mode<synchronous>, transform_indices = @transform_13, window_bounds = array<i64: 1, 64>}, {pipeline_mode = #tpu.pipeline_mode<synchronous>, transform_indices = @transform_14, window_bounds = array<i64: 64, 32>}, {pipeline_mode = #tpu.pipeline_mode<synchronous>, transform_indices = @transform_15, window_bounds = array<i64: 1, 32>}, {pipeline_mode = #tpu.pipeline_mode<synchronous>, transform_indices = @transform_16, window_bounds = array<i64: 1, 32>}, {pipeline_mode = #tpu.pipeline_mode<synchronous>, transform_indices = @transform_17, window_bounds = array<i64: 1, 32>}, {transform_indices = @transform_18, window_bounds = array<i64: 1, 8, 32>}]} {
    %c0 = arith.constant 0 : index
    %c0_0 = arith.constant 0 : index
    %c0_1 = arith.constant 0 : index
    %0 = vector.load %arg2[%c0, %c0_0, %c0_1] : memref<1x8x32xf32, #tpu.memory_space<vmem>>, vector<1x8x32xf32>
    %1 = vector.shape_cast %0 : vector<1x8x32xf32> to vector<8x32xf32>
    %c0_i32 = arith.constant 0 : i32
    %2 = arith.cmpi eq, %arg1, %c0_i32 : i32
    %3 = arith.extui %2 : i1 to i32
    %c0_i32_2 = arith.constant 0 : i32
    %4 = arith.cmpi ne, %3, %c0_i32_2 : i32
    scf.if %4 {
      %c0_122 = arith.constant 0 : index
      %c0_123 = arith.constant 0 : index
      %c0_124 = arith.constant 0 : index
      %205 = vector.load %arg3[%c0_122, %c0_123, %c0_124] : memref<1x8x32xf32, #tpu.memory_space<vmem>>, vector<1x8x32xf32>
      %206 = vector.shape_cast %205 : vector<1x8x32xf32> to vector<8x32xf32>
      %207 = arith.truncf %206 : vector<8x32xf32> to vector<8x32xbf16>
      %c0_125 = arith.constant 0 : index
      %c0_126 = arith.constant 0 : index
      %c0_127 = arith.constant 0 : index
      %208 = vector.load %arg6[%c0_125, %c0_126, %c0_127] : memref<4x32x8xbf16, #tpu.memory_space<vmem>>, vector<1x32x8xbf16>
      %209 = vector.shape_cast %208 : vector<1x32x8xbf16> to vector<32x8xbf16>
      %cst_128 = arith.constant dense<0.000000e+00> : vector<8x8xf32>
      %210 = tpu.matmul %207, %209, %cst_128 {dimension_numbers = #tpu.dot_dimension_numbers<[1], [0], [0], [1], [0, 0, 1, 1], [], []>} : vector<8x32xbf16>, vector<32x8xbf16>, vector<8x8xf32> -> vector<8x8xf32>
      %c0_129 = arith.constant 0 : index
      %c0_130 = arith.constant 0 : index
      %c0_131 = arith.constant 0 : index
      %211 = vector.load %arg7[%c0_129, %c0_130, %c0_131] : memref<4x1x8xf32, #tpu.memory_space<vmem>>, vector<1x1x8xf32>
      %212 = vector.shape_cast %211 : vector<1x1x8xf32> to vector<1x8xf32>
      %213 = vector.broadcast %212 : vector<1x8xf32> to vector<8x8xf32>
      %214 = arith.addf %210, %213 : vector<8x8xf32>
      %c0_132 = arith.constant 0 : index
      %c0_133 = arith.constant 0 : index
      %c0_134 = arith.constant 0 : index
      %215 = vector.load %arg8[%c0_132, %c0_133, %c0_134] : memref<4x32x8xbf16, #tpu.memory_space<vmem>>, vector<1x32x8xbf16>
      %216 = vector.shape_cast %215 : vector<1x32x8xbf16> to vector<32x8xbf16>
      %cst_135 = arith.constant dense<0.000000e+00> : vector<8x8xf32>
      %217 = tpu.matmul %207, %216, %cst_135 {dimension_numbers = #tpu.dot_dimension_numbers<[1], [0], [0], [1], [0, 0, 1, 1], [], []>} : vector<8x32xbf16>, vector<32x8xbf16>, vector<8x8xf32> -> vector<8x8xf32>
      %c0_136 = arith.constant 0 : index
      %c0_137 = arith.constant 0 : index
      %c0_138 = arith.constant 0 : index
      %218 = vector.load %arg9[%c0_136, %c0_137, %c0_138] : memref<4x1x8xf32, #tpu.memory_space<vmem>>, vector<1x1x8xf32>
      %219 = vector.shape_cast %218 : vector<1x1x8xf32> to vector<1x8xf32>
      %220 = vector.broadcast %219 : vector<1x8xf32> to vector<8x8xf32>
      %221 = arith.addf %217, %220 : vector<8x8xf32>
      %222 = arith.truncf %214 : vector<8x8xf32> to vector<8x8xbf16>
      %c0_139 = arith.constant 0 : index
      %c0_140 = arith.constant 0 : index
      %c0_141 = arith.constant 0 : index
      %223 = vector.load %arg21[%c0_139, %c0_140, %c0_141] : memref<4x8x8xbf16, #tpu.memory_space<vmem>>, vector<1x8x8xbf16>
      %224 = vector.shape_cast %223 : vector<1x8x8xbf16> to vector<8x8xbf16>
      %225 = vector.shape_cast %222 : vector<8x8xbf16> to vector<1x8x8xbf16>
      tpu.vector_store %arg21[%c0_139, %c0_140, %c0_141], %225 {strides = array<i32>} : memref<4x8x8xbf16, #tpu.memory_space<vmem>>, vector<1x8x8xbf16>,
      %226 = arith.truncf %221 : vector<8x8xf32> to vector<8x8xbf16>
      %c0_142 = arith.constant 0 : index
      %c0_143 = arith.constant 0 : index
      %c0_144 = arith.constant 0 : index
      %227 = vector.load %arg22[%c0_142, %c0_143, %c0_144] : memref<4x8x8xbf16, #tpu.memory_space<vmem>>, vector<1x8x8xbf16>
      %228 = vector.shape_cast %227 : vector<1x8x8xbf16> to vector<8x8xbf16>
      %229 = vector.shape_cast %226 : vector<8x8xbf16> to vector<1x8x8xbf16>
      tpu.vector_store %arg22[%c0_142, %c0_143, %c0_144], %229 {strides = array<i32>} : memref<4x8x8xbf16, #tpu.memory_space<vmem>>, vector<1x8x8xbf16>,
      %c1_145 = arith.constant 1 : index
      %c0_146 = arith.constant 0 : index
      %c0_147 = arith.constant 0 : index
      %230 = vector.load %arg6[%c1_145, %c0_146, %c0_147] : memref<4x32x8xbf16, #tpu.memory_space<vmem>>, vector<1x32x8xbf16>
      %231 = vector.shape_cast %230 : vector<1x32x8xbf16> to vector<32x8xbf16>
      %cst_148 = arith.constant dense<0.000000e+00> : vector<8x8xf32>
      %232 = tpu.matmul %207, %231, %cst_148 {dimension_numbers = #tpu.dot_dimension_numbers<[1], [0], [0], [1], [0, 0, 1, 1], [], []>} : vector<8x32xbf16>, vector<32x8xbf16>, vector<8x8xf32> -> vector<8x8xf32>
      %c1_149 = arith.constant 1 : index
      %c0_150 = arith.constant 0 : index
      %c0_151 = arith.constant 0 : index
      %233 = vector.load %arg7[%c1_149, %c0_150, %c0_151] : memref<4x1x8xf32, #tpu.memory_space<vmem>>, vector<1x1x8xf32>
      %234 = vector.shape_cast %233 : vector<1x1x8xf32> to vector<1x8xf32>
      %235 = vector.broadcast %234 : vector<1x8xf32> to vector<8x8xf32>
      %236 = arith.addf %232, %235 : vector<8x8xf32>
      %c1_152 = arith.constant 1 : index
      %c0_153 = arith.constant 0 : index
      %c0_154 = arith.constant 0 : index
      %237 = vector.load %arg8[%c1_152, %c0_153, %c0_154] : memref<4x32x8xbf16, #tpu.memory_space<vmem>>, vector<1x32x8xbf16>
      %238 = vector.shape_cast %237 : vector<1x32x8xbf16> to vector<32x8xbf16>
      %cst_155 = arith.constant dense<0.000000e+00> : vector<8x8xf32>
      %239 = tpu.matmul %207, %238, %cst_155 {dimension_numbers = #tpu.dot_dimension_numbers<[1], [0], [0], [1], [0, 0, 1, 1], [], []>} : vector<8x32xbf16>, vector<32x8xbf16>, vector<8x8xf32> -> vector<8x8xf32>
      %c1_156 = arith.constant 1 : index
      %c0_157 = arith.constant 0 : index
      %c0_158 = arith.constant 0 : index
      %240 = vector.load %arg9[%c1_156, %c0_157, %c0_158] : memref<4x1x8xf32, #tpu.memory_space<vmem>>, vector<1x1x8xf32>
      %241 = vector.shape_cast %240 : vector<1x1x8xf32> to vector<1x8xf32>
      %242 = vector.broadcast %241 : vector<1x8xf32> to vector<8x8xf32>
      %243 = arith.addf %239, %242 : vector<8x8xf32>
      %244 = arith.truncf %236 : vector<8x8xf32> to vector<8x8xbf16>
      %c1_159 = arith.constant 1 : index
      %c0_160 = arith.constant 0 : index
      %c0_161 = arith.constant 0 : index
      %245 = vector.load %arg21[%c1_159, %c0_160, %c0_161] : memref<4x8x8xbf16, #tpu.memory_space<vmem>>, vector<1x8x8xbf16>
      %246 = vector.shape_cast %245 : vector<1x8x8xbf16> to vector<8x8xbf16>
      %247 = vector.shape_cast %244 : vector<8x8xbf16> to vector<1x8x8xbf16>
      tpu.vector_store %arg21[%c1_159, %c0_160, %c0_161], %247 {strides = array<i32>} : memref<4x8x8xbf16, #tpu.memory_space<vmem>>, vector<1x8x8xbf16>,
      %248 = arith.truncf %243 : vector<8x8xf32> to vector<8x8xbf16>
      %c1_162 = arith.constant 1 : index
      %c0_163 = arith.constant 0 : index
      %c0_164 = arith.constant 0 : index
      %249 = vector.load %arg22[%c1_162, %c0_163, %c0_164] : memref<4x8x8xbf16, #tpu.memory_space<vmem>>, vector<1x8x8xbf16>
      %250 = vector.shape_cast %249 : vector<1x8x8xbf16> to vector<8x8xbf16>
      %251 = vector.shape_cast %248 : vector<8x8xbf16> to vector<1x8x8xbf16>
      tpu.vector_store %arg22[%c1_162, %c0_163, %c0_164], %251 {strides = array<i32>} : memref<4x8x8xbf16, #tpu.memory_space<vmem>>, vector<1x8x8xbf16>,
      %c2_165 = arith.constant 2 : index
      %c0_166 = arith.constant 0 : index
      %c0_167 = arith.constant 0 : index
      %252 = vector.load %arg6[%c2_165, %c0_166, %c0_167] : memref<4x32x8xbf16, #tpu.memory_space<vmem>>, vector<1x32x8xbf16>
      %253 = vector.shape_cast %252 : vector<1x32x8xbf16> to vector<32x8xbf16>
      %cst_168 = arith.constant dense<0.000000e+00> : vector<8x8xf32>
      %254 = tpu.matmul %207, %253, %cst_168 {dimension_numbers = #tpu.dot_dimension_numbers<[1], [0], [0], [1], [0, 0, 1, 1], [], []>} : vector<8x32xbf16>, vector<32x8xbf16>, vector<8x8xf32> -> vector<8x8xf32>
      %c2_169 = arith.constant 2 : index
      %c0_170 = arith.constant 0 : index
      %c0_171 = arith.constant 0 : index
      %255 = vector.load %arg7[%c2_169, %c0_170, %c0_171] : memref<4x1x8xf32, #tpu.memory_space<vmem>>, vector<1x1x8xf32>
      %256 = vector.shape_cast %255 : vector<1x1x8xf32> to vector<1x8xf32>
      %257 = vector.broadcast %256 : vector<1x8xf32> to vector<8x8xf32>
      %258 = arith.addf %254, %257 : vector<8x8xf32>
      %c2_172 = arith.constant 2 : index
      %c0_173 = arith.constant 0 : index
      %c0_174 = arith.constant 0 : index
      %259 = vector.load %arg8[%c2_172, %c0_173, %c0_174] : memref<4x32x8xbf16, #tpu.memory_space<vmem>>, vector<1x32x8xbf16>
      %260 = vector.shape_cast %259 : vector<1x32x8xbf16> to vector<32x8xbf16>
      %cst_175 = arith.constant dense<0.000000e+00> : vector<8x8xf32>
      %261 = tpu.matmul %207, %260, %cst_175 {dimension_numbers = #tpu.dot_dimension_numbers<[1], [0], [0], [1], [0, 0, 1, 1], [], []>} : vector<8x32xbf16>, vector<32x8xbf16>, vector<8x8xf32> -> vector<8x8xf32>
      %c2_176 = arith.constant 2 : index
      %c0_177 = arith.constant 0 : index
      %c0_178 = arith.constant 0 : index
      %262 = vector.load %arg9[%c2_176, %c0_177, %c0_178] : memref<4x1x8xf32, #tpu.memory_space<vmem>>, vector<1x1x8xf32>
      %263 = vector.shape_cast %262 : vector<1x1x8xf32> to vector<1x8xf32>
      %264 = vector.broadcast %263 : vector<1x8xf32> to vector<8x8xf32>
      %265 = arith.addf %261, %264 : vector<8x8xf32>
      %266 = arith.truncf %258 : vector<8x8xf32> to vector<8x8xbf16>
      %c2_179 = arith.constant 2 : index
      %c0_180 = arith.constant 0 : index
      %c0_181 = arith.constant 0 : index
      %267 = vector.load %arg21[%c2_179, %c0_180, %c0_181] : memref<4x8x8xbf16, #tpu.memory_space<vmem>>, vector<1x8x8xbf16>
      %268 = vector.shape_cast %267 : vector<1x8x8xbf16> to vector<8x8xbf16>
      %269 = vector.shape_cast %266 : vector<8x8xbf16> to vector<1x8x8xbf16>
      tpu.vector_store %arg21[%c2_179, %c0_180, %c0_181], %269 {strides = array<i32>} : memref<4x8x8xbf16, #tpu.memory_space<vmem>>, vector<1x8x8xbf16>,
      %270 = arith.truncf %265 : vector<8x8xf32> to vector<8x8xbf16>
      %c2_182 = arith.constant 2 : index
      %c0_183 = arith.constant 0 : index
      %c0_184 = arith.constant 0 : index
      %271 = vector.load %arg22[%c2_182, %c0_183, %c0_184] : memref<4x8x8xbf16, #tpu.memory_space<vmem>>, vector<1x8x8xbf16>
      %272 = vector.shape_cast %271 : vector<1x8x8xbf16> to vector<8x8xbf16>
      %273 = vector.shape_cast %270 : vector<8x8xbf16> to vector<1x8x8xbf16>
      tpu.vector_store %arg22[%c2_182, %c0_183, %c0_184], %273 {strides = array<i32>} : memref<4x8x8xbf16, #tpu.memory_space<vmem>>, vector<1x8x8xbf16>,
      %c3_185 = arith.constant 3 : index
      %c0_186 = arith.constant 0 : index
      %c0_187 = arith.constant 0 : index
      %274 = vector.load %arg6[%c3_185, %c0_186, %c0_187] : memref<4x32x8xbf16, #tpu.memory_space<vmem>>, vector<1x32x8xbf16>
      %275 = vector.shape_cast %274 : vector<1x32x8xbf16> to vector<32x8xbf16>
      %cst_188 = arith.constant dense<0.000000e+00> : vector<8x8xf32>
      %276 = tpu.matmul %207, %275, %cst_188 {dimension_numbers = #tpu.dot_dimension_numbers<[1], [0], [0], [1], [0, 0, 1, 1], [], []>} : vector<8x32xbf16>, vector<32x8xbf16>, vector<8x8xf32> -> vector<8x8xf32>
      %c3_189 = arith.constant 3 : index
      %c0_190 = arith.constant 0 : index
      %c0_191 = arith.constant 0 : index
      %277 = vector.load %arg7[%c3_189, %c0_190, %c0_191] : memref<4x1x8xf32, #tpu.memory_space<vmem>>, vector<1x1x8xf32>
      %278 = vector.shape_cast %277 : vector<1x1x8xf32> to vector<1x8xf32>
      %279 = vector.broadcast %278 : vector<1x8xf32> to vector<8x8xf32>
      %280 = arith.addf %276, %279 : vector<8x8xf32>
      %c3_192 = arith.constant 3 : index
      %c0_193 = arith.constant 0 : index
      %c0_194 = arith.constant 0 : index
      %281 = vector.load %arg8[%c3_192, %c0_193, %c0_194] : memref<4x32x8xbf16, #tpu.memory_space<vmem>>, vector<1x32x8xbf16>
      %282 = vector.shape_cast %281 : vector<1x32x8xbf16> to vector<32x8xbf16>
      %cst_195 = arith.constant dense<0.000000e+00> : vector<8x8xf32>
      %283 = tpu.matmul %207, %282, %cst_195 {dimension_numbers = #tpu.dot_dimension_numbers<[1], [0], [0], [1], [0, 0, 1, 1], [], []>} : vector<8x32xbf16>, vector<32x8xbf16>, vector<8x8xf32> -> vector<8x8xf32>
      %c3_196 = arith.constant 3 : index
      %c0_197 = arith.constant 0 : index
      %c0_198 = arith.constant 0 : index
      %284 = vector.load %arg9[%c3_196, %c0_197, %c0_198] : memref<4x1x8xf32, #tpu.memory_space<vmem>>, vector<1x1x8xf32>
      %285 = vector.shape_cast %284 : vector<1x1x8xf32> to vector<1x8xf32>
      %286 = vector.broadcast %285 : vector<1x8xf32> to vector<8x8xf32>
      %287 = arith.addf %283, %286 : vector<8x8xf32>
      %288 = arith.truncf %280 : vector<8x8xf32> to vector<8x8xbf16>
      %c3_199 = arith.constant 3 : index
      %c0_200 = arith.constant 0 : index
      %c0_201 = arith.constant 0 : index
      %289 = vector.load %arg21[%c3_199, %c0_200, %c0_201] : memref<4x8x8xbf16, #tpu.memory_space<vmem>>, vector<1x8x8xbf16>
      %290 = vector.shape_cast %289 : vector<1x8x8xbf16> to vector<8x8xbf16>
      %291 = vector.shape_cast %288 : vector<8x8xbf16> to vector<1x8x8xbf16>
      tpu.vector_store %arg21[%c3_199, %c0_200, %c0_201], %291 {strides = array<i32>} : memref<4x8x8xbf16, #tpu.memory_space<vmem>>, vector<1x8x8xbf16>,
      %292 = arith.truncf %287 : vector<8x8xf32> to vector<8x8xbf16>
      %c3_202 = arith.constant 3 : index
      %c0_203 = arith.constant 0 : index
      %c0_204 = arith.constant 0 : index
      %293 = vector.load %arg22[%c3_202, %c0_203, %c0_204] : memref<4x8x8xbf16, #tpu.memory_space<vmem>>, vector<1x8x8xbf16>
      %294 = vector.shape_cast %293 : vector<1x8x8xbf16> to vector<8x8xbf16>
      %295 = vector.shape_cast %292 : vector<8x8xbf16> to vector<1x8x8xbf16>
      tpu.vector_store %arg22[%c3_202, %c0_203, %c0_204], %295 {strides = array<i32>} : memref<4x8x8xbf16, #tpu.memory_space<vmem>>, vector<1x8x8xbf16>,
    } else {
    }
    %5 = arith.truncf %1 : vector<8x32xf32> to vector<8x32xbf16>
    %cst = arith.constant 0.000000e+00 : f32
    %6 = vector.broadcast %cst : f32 to vector<8x32xf32>
    %c0_3 = arith.constant 0 : index
    %c0_4 = arith.constant 0 : index
    %c0_5 = arith.constant 0 : index
    %7 = vector.load %arg4[%c0_3, %c0_4, %c0_5] : memref<4x32x8xbf16, #tpu.memory_space<vmem>>, vector<1x32x8xbf16>
    %8 = vector.shape_cast %7 : vector<1x32x8xbf16> to vector<32x8xbf16>
    %cst_6 = arith.constant dense<0.000000e+00> : vector<8x8xf32>
    %9 = tpu.matmul %5, %8, %cst_6 {dimension_numbers = #tpu.dot_dimension_numbers<[1], [0], [0], [1], [0, 0, 1, 1], [], []>} : vector<8x32xbf16>, vector<32x8xbf16>, vector<8x8xf32> -> vector<8x8xf32>
    %c0_7 = arith.constant 0 : index
    %c0_8 = arith.constant 0 : index
    %c0_9 = arith.constant 0 : index
    %10 = vector.load %arg5[%c0_7, %c0_8, %c0_9] : memref<4x1x8xf32, #tpu.memory_space<vmem>>, vector<1x1x8xf32>
    %11 = vector.shape_cast %10 : vector<1x1x8xf32> to vector<1x8xf32>
    %12 = vector.broadcast %11 : vector<1x8xf32> to vector<8x8xf32>
    %13 = arith.addf %9, %12 : vector<8x8xf32>
    %cst_10 = arith.constant 0.353553385 : f32
    %14 = vector.broadcast %cst_10 : f32 to vector<8x8xf32>
    %15 = arith.mulf %13, %14 : vector<8x8xf32>
    %c0_11 = arith.constant 0 : index
    %c0_12 = arith.constant 0 : index
    %c0_13 = arith.constant 0 : index
    %16 = vector.load %arg21[%c0_11, %c0_12, %c0_13] : memref<4x8x8xbf16, #tpu.memory_space<vmem>>, vector<1x8x8xbf16>
    %17 = vector.shape_cast %16 : vector<1x8x8xbf16> to vector<8x8xbf16>
    %c0_14 = arith.constant 0 : index
    %c0_15 = arith.constant 0 : index
    %c0_16 = arith.constant 0 : index
    %18 = vector.load %arg22[%c0_14, %c0_15, %c0_16] : memref<4x8x8xbf16, #tpu.memory_space<vmem>>, vector<1x8x8xbf16>
    %19 = vector.shape_cast %18 : vector<1x8x8xbf16> to vector<8x8xbf16>
    %20 = arith.truncf %15 : vector<8x8xf32> to vector<8x8xbf16>
    %cst_17 = arith.constant dense<0.000000e+00> : vector<8x8xf32>
    %21 = tpu.matmul %20, %17, %cst_17 {dimension_numbers = #tpu.dot_dimension_numbers<[1], [1], [0], [0], [0, 0, 1, 0], [], []>} : vector<8x8xbf16>, vector<8x8xbf16>, vector<8x8xf32> -> vector<8x8xf32>
    %cst_18 = arith.constant dense<0xFF800000> : vector<8xf32>
    %22 = vector.multi_reduction <maximumf>, %21, %cst_18 [1] : vector<8x8xf32> to vector<8xf32>
    %23 = vector.shape_cast %22 : vector<8xf32> to vector<8x1xf32>
    %24 = vector.broadcast %23 : vector<8x1xf32> to vector<8x8xf32>
    %25 = arith.subf %21, %24 : vector<8x8xf32>
    %26 = math.exp %25 : vector<8x8xf32>
    %cst_19 = arith.constant dense<0.000000e+00> : vector<8xf32>
    %27 = vector.multi_reduction <add>, %26, %cst_19 [1] : vector<8x8xf32> to vector<8xf32>
    %28 = vector.shape_cast %27 : vector<8xf32> to vector<8x1xf32>
    %29 = tpu.reciprocal %28 {approx = true} : vector<8x1xf32> -> vector<8x1xf32>
    %30 = vector.broadcast %29 : vector<8x1xf32> to vector<8x8xf32>
    %31 = arith.mulf %26, %30 : vector<8x8xf32>
    %32 = arith.truncf %31 : vector<8x8xf32> to vector<8x8xbf16>
    %cst_20 = arith.constant dense<0.000000e+00> : vector<8x8xf32>
    %33 = tpu.matmul %32, %19, %cst_20 {dimension_numbers = #tpu.dot_dimension_numbers<[1], [0], [0], [1], [0, 0, 1, 1], [], []>} : vector<8x8xbf16>, vector<8x8xbf16>, vector<8x8xf32> -> vector<8x8xf32>
    %34 = arith.truncf %33 : vector<8x8xf32> to vector<8x8xbf16>
    %c0_21 = arith.constant 0 : index
    %c0_22 = arith.constant 0 : index
    %c0_23 = arith.constant 0 : index
    %35 = vector.load %arg10[%c0_21, %c0_22, %c0_23] : memref<4x8x32xbf16, #tpu.memory_space<vmem>>, vector<1x8x32xbf16>
    %36 = vector.shape_cast %35 : vector<1x8x32xbf16> to vector<8x32xbf16>
    %cst_24 = arith.constant dense<0.000000e+00> : vector<8x32xf32>
    %37 = tpu.matmul %34, %36, %cst_24 {dimension_numbers = #tpu.dot_dimension_numbers<[1], [0], [0], [1], [0, 0, 1, 1], [], []>} : vector<8x8xbf16>, vector<8x32xbf16>, vector<8x32xf32> -> vector<8x32xf32>
    %38 = arith.addf %6, %37 : vector<8x32xf32>
    %c1 = arith.constant 1 : index
    %c0_25 = arith.constant 0 : index
    %c0_26 = arith.constant 0 : index
    %39 = vector.load %arg4[%c1, %c0_25, %c0_26] : memref<4x32x8xbf16, #tpu.memory_space<vmem>>, vector<1x32x8xbf16>
    %40 = vector.shape_cast %39 : vector<1x32x8xbf16> to vector<32x8xbf16>
    %cst_27 = arith.constant dense<0.000000e+00> : vector<8x8xf32>
    %41 = tpu.matmul %5, %40, %cst_27 {dimension_numbers = #tpu.dot_dimension_numbers<[1], [0], [0], [1], [0, 0, 1, 1], [], []>} : vector<8x32xbf16>, vector<32x8xbf16>, vector<8x8xf32> -> vector<8x8xf32>
    %c1_28 = arith.constant 1 : index
    %c0_29 = arith.constant 0 : index
    %c0_30 = arith.constant 0 : index
    %42 = vector.load %arg5[%c1_28, %c0_29, %c0_30] : memref<4x1x8xf32, #tpu.memory_space<vmem>>, vector<1x1x8xf32>
    %43 = vector.shape_cast %42 : vector<1x1x8xf32> to vector<1x8xf32>
    %44 = vector.broadcast %43 : vector<1x8xf32> to vector<8x8xf32>
    %45 = arith.addf %41, %44 : vector<8x8xf32>
    %cst_31 = arith.constant 0.353553385 : f32
    %46 = vector.broadcast %cst_31 : f32 to vector<8x8xf32>
    %47 = arith.mulf %45, %46 : vector<8x8xf32>
    %c1_32 = arith.constant 1 : index
    %c0_33 = arith.constant 0 : index
    %c0_34 = arith.constant 0 : index
    %48 = vector.load %arg21[%c1_32, %c0_33, %c0_34] : memref<4x8x8xbf16, #tpu.memory_space<vmem>>, vector<1x8x8xbf16>
    %49 = vector.shape_cast %48 : vector<1x8x8xbf16> to vector<8x8xbf16>
    %c1_35 = arith.constant 1 : index
    %c0_36 = arith.constant 0 : index
    %c0_37 = arith.constant 0 : index
    %50 = vector.load %arg22[%c1_35, %c0_36, %c0_37] : memref<4x8x8xbf16, #tpu.memory_space<vmem>>, vector<1x8x8xbf16>
    %51 = vector.shape_cast %50 : vector<1x8x8xbf16> to vector<8x8xbf16>
    %52 = arith.truncf %47 : vector<8x8xf32> to vector<8x8xbf16>
    %cst_38 = arith.constant dense<0.000000e+00> : vector<8x8xf32>
    %53 = tpu.matmul %52, %49, %cst_38 {dimension_numbers = #tpu.dot_dimension_numbers<[1], [1], [0], [0], [0, 0, 1, 0], [], []>} : vector<8x8xbf16>, vector<8x8xbf16>, vector<8x8xf32> -> vector<8x8xf32>
    %cst_39 = arith.constant dense<0xFF800000> : vector<8xf32>
    %54 = vector.multi_reduction <maximumf>, %53, %cst_39 [1] : vector<8x8xf32> to vector<8xf32>
    %55 = vector.shape_cast %54 : vector<8xf32> to vector<8x1xf32>
    %56 = vector.broadcast %55 : vector<8x1xf32> to vector<8x8xf32>
    %57 = arith.subf %53, %56 : vector<8x8xf32>
    %58 = math.exp %57 : vector<8x8xf32>
    %cst_40 = arith.constant dense<0.000000e+00> : vector<8xf32>
    %59 = vector.multi_reduction <add>, %58, %cst_40 [1] : vector<8x8xf32> to vector<8xf32>
    %60 = vector.shape_cast %59 : vector<8xf32> to vector<8x1xf32>
    %61 = tpu.reciprocal %60 {approx = true} : vector<8x1xf32> -> vector<8x1xf32>
    %62 = vector.broadcast %61 : vector<8x1xf32> to vector<8x8xf32>
    %63 = arith.mulf %58, %62 : vector<8x8xf32>
    %64 = arith.truncf %63 : vector<8x8xf32> to vector<8x8xbf16>
    %cst_41 = arith.constant dense<0.000000e+00> : vector<8x8xf32>
    %65 = tpu.matmul %64, %51, %cst_41 {dimension_numbers = #tpu.dot_dimension_numbers<[1], [0], [0], [1], [0, 0, 1, 1], [], []>} : vector<8x8xbf16>, vector<8x8xbf16>, vector<8x8xf32> -> vector<8x8xf32>
    %66 = arith.truncf %65 : vector<8x8xf32> to vector<8x8xbf16>
    %c1_42 = arith.constant 1 : index
    %c0_43 = arith.constant 0 : index
    %c0_44 = arith.constant 0 : index
    %67 = vector.load %arg10[%c1_42, %c0_43, %c0_44] : memref<4x8x32xbf16, #tpu.memory_space<vmem>>, vector<1x8x32xbf16>
    %68 = vector.shape_cast %67 : vector<1x8x32xbf16> to vector<8x32xbf16>
    %cst_45 = arith.constant dense<0.000000e+00> : vector<8x32xf32>
    %69 = tpu.matmul %66, %68, %cst_45 {dimension_numbers = #tpu.dot_dimension_numbers<[1], [0], [0], [1], [0, 0, 1, 1], [], []>} : vector<8x8xbf16>, vector<8x32xbf16>, vector<8x32xf32> -> vector<8x32xf32>
    %70 = arith.addf %38, %69 : vector<8x32xf32>
    %c2 = arith.constant 2 : index
    %c0_46 = arith.constant 0 : index
    %c0_47 = arith.constant 0 : index
    %71 = vector.load %arg4[%c2, %c0_46, %c0_47] : memref<4x32x8xbf16, #tpu.memory_space<vmem>>, vector<1x32x8xbf16>
    %72 = vector.shape_cast %71 : vector<1x32x8xbf16> to vector<32x8xbf16>
    %cst_48 = arith.constant dense<0.000000e+00> : vector<8x8xf32>
    %73 = tpu.matmul %5, %72, %cst_48 {dimension_numbers = #tpu.dot_dimension_numbers<[1], [0], [0], [1], [0, 0, 1, 1], [], []>} : vector<8x32xbf16>, vector<32x8xbf16>, vector<8x8xf32> -> vector<8x8xf32>
    %c2_49 = arith.constant 2 : index
    %c0_50 = arith.constant 0 : index
    %c0_51 = arith.constant 0 : index
    %74 = vector.load %arg5[%c2_49, %c0_50, %c0_51] : memref<4x1x8xf32, #tpu.memory_space<vmem>>, vector<1x1x8xf32>
    %75 = vector.shape_cast %74 : vector<1x1x8xf32> to vector<1x8xf32>
    %76 = vector.broadcast %75 : vector<1x8xf32> to vector<8x8xf32>
    %77 = arith.addf %73, %76 : vector<8x8xf32>
    %cst_52 = arith.constant 0.353553385 : f32
    %78 = vector.broadcast %cst_52 : f32 to vector<8x8xf32>
    %79 = arith.mulf %77, %78 : vector<8x8xf32>
    %c2_53 = arith.constant 2 : index
    %c0_54 = arith.constant 0 : index
    %c0_55 = arith.constant 0 : index
    %80 = vector.load %arg21[%c2_53, %c0_54, %c0_55] : memref<4x8x8xbf16, #tpu.memory_space<vmem>>, vector<1x8x8xbf16>
    %81 = vector.shape_cast %80 : vector<1x8x8xbf16> to vector<8x8xbf16>
    %c2_56 = arith.constant 2 : index
    %c0_57 = arith.constant 0 : index
    %c0_58 = arith.constant 0 : index
    %82 = vector.load %arg22[%c2_56, %c0_57, %c0_58] : memref<4x8x8xbf16, #tpu.memory_space<vmem>>, vector<1x8x8xbf16>
    %83 = vector.shape_cast %82 : vector<1x8x8xbf16> to vector<8x8xbf16>
    %84 = arith.truncf %79 : vector<8x8xf32> to vector<8x8xbf16>
    %cst_59 = arith.constant dense<0.000000e+00> : vector<8x8xf32>
    %85 = tpu.matmul %84, %81, %cst_59 {dimension_numbers = #tpu.dot_dimension_numbers<[1], [1], [0], [0], [0, 0, 1, 0], [], []>} : vector<8x8xbf16>, vector<8x8xbf16>, vector<8x8xf32> -> vector<8x8xf32>
    %cst_60 = arith.constant dense<0xFF800000> : vector<8xf32>
    %86 = vector.multi_reduction <maximumf>, %85, %cst_60 [1] : vector<8x8xf32> to vector<8xf32>
    %87 = vector.shape_cast %86 : vector<8xf32> to vector<8x1xf32>
    %88 = vector.broadcast %87 : vector<8x1xf32> to vector<8x8xf32>
    %89 = arith.subf %85, %88 : vector<8x8xf32>
    %90 = math.exp %89 : vector<8x8xf32>
    %cst_61 = arith.constant dense<0.000000e+00> : vector<8xf32>
    %91 = vector.multi_reduction <add>, %90, %cst_61 [1] : vector<8x8xf32> to vector<8xf32>
    %92 = vector.shape_cast %91 : vector<8xf32> to vector<8x1xf32>
    %93 = tpu.reciprocal %92 {approx = true} : vector<8x1xf32> -> vector<8x1xf32>
    %94 = vector.broadcast %93 : vector<8x1xf32> to vector<8x8xf32>
    %95 = arith.mulf %90, %94 : vector<8x8xf32>
    %96 = arith.truncf %95 : vector<8x8xf32> to vector<8x8xbf16>
    %cst_62 = arith.constant dense<0.000000e+00> : vector<8x8xf32>
    %97 = tpu.matmul %96, %83, %cst_62 {dimension_numbers = #tpu.dot_dimension_numbers<[1], [0], [0], [1], [0, 0, 1, 1], [], []>} : vector<8x8xbf16>, vector<8x8xbf16>, vector<8x8xf32> -> vector<8x8xf32>
    %98 = arith.truncf %97 : vector<8x8xf32> to vector<8x8xbf16>
    %c2_63 = arith.constant 2 : index
    %c0_64 = arith.constant 0 : index
    %c0_65 = arith.constant 0 : index
    %99 = vector.load %arg10[%c2_63, %c0_64, %c0_65] : memref<4x8x32xbf16, #tpu.memory_space<vmem>>, vector<1x8x32xbf16>
    %100 = vector.shape_cast %99 : vector<1x8x32xbf16> to vector<8x32xbf16>
    %cst_66 = arith.constant dense<0.000000e+00> : vector<8x32xf32>
    %101 = tpu.matmul %98, %100, %cst_66 {dimension_numbers = #tpu.dot_dimension_numbers<[1], [0], [0], [1], [0, 0, 1, 1], [], []>} : vector<8x8xbf16>, vector<8x32xbf16>, vector<8x32xf32> -> vector<8x32xf32>
    %102 = arith.addf %70, %101 : vector<8x32xf32>
    %c3 = arith.constant 3 : index
    %c0_67 = arith.constant 0 : index
    %c0_68 = arith.constant 0 : index
    %103 = vector.load %arg4[%c3, %c0_67, %c0_68] : memref<4x32x8xbf16, #tpu.memory_space<vmem>>, vector<1x32x8xbf16>
    %104 = vector.shape_cast %103 : vector<1x32x8xbf16> to vector<32x8xbf16>
    %cst_69 = arith.constant dense<0.000000e+00> : vector<8x8xf32>
    %105 = tpu.matmul %5, %104, %cst_69 {dimension_numbers = #tpu.dot_dimension_numbers<[1], [0], [0], [1], [0, 0, 1, 1], [], []>} : vector<8x32xbf16>, vector<32x8xbf16>, vector<8x8xf32> -> vector<8x8xf32>
    %c3_70 = arith.constant 3 : index
    %c0_71 = arith.constant 0 : index
    %c0_72 = arith.constant 0 : index
    %106 = vector.load %arg5[%c3_70, %c0_71, %c0_72] : memref<4x1x8xf32, #tpu.memory_space<vmem>>, vector<1x1x8xf32>
    %107 = vector.shape_cast %106 : vector<1x1x8xf32> to vector<1x8xf32>
    %108 = vector.broadcast %107 : vector<1x8xf32> to vector<8x8xf32>
    %109 = arith.addf %105, %108 : vector<8x8xf32>
    %cst_73 = arith.constant 0.353553385 : f32
    %110 = vector.broadcast %cst_73 : f32 to vector<8x8xf32>
    %111 = arith.mulf %109, %110 : vector<8x8xf32>
    %c3_74 = arith.constant 3 : index
    %c0_75 = arith.constant 0 : index
    %c0_76 = arith.constant 0 : index
    %112 = vector.load %arg21[%c3_74, %c0_75, %c0_76] : memref<4x8x8xbf16, #tpu.memory_space<vmem>>, vector<1x8x8xbf16>
    %113 = vector.shape_cast %112 : vector<1x8x8xbf16> to vector<8x8xbf16>
    %c3_77 = arith.constant 3 : index
    %c0_78 = arith.constant 0 : index
    %c0_79 = arith.constant 0 : index
    %114 = vector.load %arg22[%c3_77, %c0_78, %c0_79] : memref<4x8x8xbf16, #tpu.memory_space<vmem>>, vector<1x8x8xbf16>
    %115 = vector.shape_cast %114 : vector<1x8x8xbf16> to vector<8x8xbf16>
    %116 = arith.truncf %111 : vector<8x8xf32> to vector<8x8xbf16>
    %cst_80 = arith.constant dense<0.000000e+00> : vector<8x8xf32>
    %117 = tpu.matmul %116, %113, %cst_80 {dimension_numbers = #tpu.dot_dimension_numbers<[1], [1], [0], [0], [0, 0, 1, 0], [], []>} : vector<8x8xbf16>, vector<8x8xbf16>, vector<8x8xf32> -> vector<8x8xf32>
    %cst_81 = arith.constant dense<0xFF800000> : vector<8xf32>
    %118 = vector.multi_reduction <maximumf>, %117, %cst_81 [1] : vector<8x8xf32> to vector<8xf32>
    %119 = vector.shape_cast %118 : vector<8xf32> to vector<8x1xf32>
    %120 = vector.broadcast %119 : vector<8x1xf32> to vector<8x8xf32>
    %121 = arith.subf %117, %120 : vector<8x8xf32>
    %122 = math.exp %121 : vector<8x8xf32>
    %cst_82 = arith.constant dense<0.000000e+00> : vector<8xf32>
    %123 = vector.multi_reduction <add>, %122, %cst_82 [1] : vector<8x8xf32> to vector<8xf32>
    %124 = vector.shape_cast %123 : vector<8xf32> to vector<8x1xf32>
    %125 = tpu.reciprocal %124 {approx = true} : vector<8x1xf32> -> vector<8x1xf32>
    %126 = vector.broadcast %125 : vector<8x1xf32> to vector<8x8xf32>
    %127 = arith.mulf %122, %126 : vector<8x8xf32>
    %128 = arith.truncf %127 : vector<8x8xf32> to vector<8x8xbf16>
    %cst_83 = arith.constant dense<0.000000e+00> : vector<8x8xf32>
    %129 = tpu.matmul %128, %115, %cst_83 {dimension_numbers = #tpu.dot_dimension_numbers<[1], [0], [0], [1], [0, 0, 1, 1], [], []>} : vector<8x8xbf16>, vector<8x8xbf16>, vector<8x8xf32> -> vector<8x8xf32>
    %130 = arith.truncf %129 : vector<8x8xf32> to vector<8x8xbf16>
    %c3_84 = arith.constant 3 : index
    %c0_85 = arith.constant 0 : index
    %c0_86 = arith.constant 0 : index
    %131 = vector.load %arg10[%c3_84, %c0_85, %c0_86] : memref<4x8x32xbf16, #tpu.memory_space<vmem>>, vector<1x8x32xbf16>
    %132 = vector.shape_cast %131 : vector<1x8x32xbf16> to vector<8x32xbf16>
    %cst_87 = arith.constant dense<0.000000e+00> : vector<8x32xf32>
    %133 = tpu.matmul %130, %132, %cst_87 {dimension_numbers = #tpu.dot_dimension_numbers<[1], [0], [0], [1], [0, 0, 1, 1], [], []>} : vector<8x8xbf16>, vector<8x32xbf16>, vector<8x32xf32> -> vector<8x32xf32>
    %134 = arith.addf %102, %133 : vector<8x32xf32>
    %c0_88 = arith.constant 0 : index
    %c0_89 = arith.constant 0 : index
    %135 = vector.load %arg11[%c0_88, %c0_89] : memref<1x32xf32, #tpu.memory_space<vmem>>, vector<1x32xf32>
    %136 = vector.broadcast %135 : vector<1x32xf32> to vector<8x32xf32>
    %137 = arith.addf %134, %136 : vector<8x32xf32>
    %138 = arith.addf %1, %137 : vector<8x32xf32>
    %c0_90 = arith.constant 0 : index
    %c0_91 = arith.constant 0 : index
    %139 = vector.load %arg12[%c0_90, %c0_91] : memref<1x32xf32, #tpu.memory_space<vmem>>, vector<1x32xf32>
    %c0_92 = arith.constant 0 : index
    %c0_93 = arith.constant 0 : index
    %140 = vector.load %arg13[%c0_92, %c0_93] : memref<1x32xf32, #tpu.memory_space<vmem>>, vector<1x32xf32>
    %cst_94 = arith.constant dense<0.000000e+00> : vector<8xf32>
    %141 = vector.multi_reduction <add>, %138, %cst_94 [1] : vector<8x32xf32> to vector<8xf32>
    %142 = vector.shape_cast %141 : vector<8xf32> to vector<8x1xf32>
    %cst_95 = arith.constant 3.200000e+01 : f32
    %143 = vector.broadcast %cst_95 : f32 to vector<8x1xf32>
    %144 = arith.divf %142, %143 : vector<8x1xf32>
    %145 = vector.broadcast %144 : vector<8x1xf32> to vector<8x32xf32>
    %146 = arith.subf %138, %145 : vector<8x32xf32>
    %147 = arith.mulf %146, %146 : vector<8x32xf32>
    %cst_96 = arith.constant dense<0.000000e+00> : vector<8xf32>
    %148 = vector.multi_reduction <add>, %147, %cst_96 [1] : vector<8x32xf32> to vector<8xf32>
    %149 = vector.shape_cast %148 : vector<8xf32> to vector<8x1xf32>
    %cst_97 = arith.constant 3.200000e+01 : f32
    %150 = vector.broadcast %cst_97 : f32 to vector<8x1xf32>
    %151 = arith.divf %149, %150 : vector<8x1xf32>
    %152 = vector.broadcast %144 : vector<8x1xf32> to vector<8x32xf32>
    %153 = arith.subf %138, %152 : vector<8x32xf32>
    %cst_98 = arith.constant 9.99999974E-6 : f32
    %154 = vector.broadcast %cst_98 : f32 to vector<8x1xf32>
    %155 = arith.addf %151, %154 : vector<8x1xf32>
    %156 = math.rsqrt %155 : vector<8x1xf32>
    %157 = vector.broadcast %156 : vector<8x1xf32> to vector<8x32xf32>
    %158 = arith.mulf %153, %157 : vector<8x32xf32>
    %159 = vector.broadcast %139 : vector<1x32xf32> to vector<8x32xf32>
    %160 = arith.mulf %158, %159 : vector<8x32xf32>
    %161 = vector.broadcast %140 : vector<1x32xf32> to vector<8x32xf32>
    %162 = arith.addf %160, %161 : vector<8x32xf32>
    %163 = arith.truncf %162 : vector<8x32xf32> to vector<8x32xbf16>
    %c0_99 = arith.constant 0 : index
    %c0_100 = arith.constant 0 : index
    %164 = vector.load %arg14[%c0_99, %c0_100] : memref<32x64xbf16, #tpu.memory_space<vmem>>, vector<32x64xbf16>
    %cst_101 = arith.constant dense<0.000000e+00> : vector<8x64xf32>
    %165 = tpu.matmul %163, %164, %cst_101 {dimension_numbers = #tpu.dot_dimension_numbers<[1], [0], [0], [1], [0, 0, 1, 1], [], []>} : vector<8x32xbf16>, vector<32x64xbf16>, vector<8x64xf32> -> vector<8x64xf32>
    %c0_102 = arith.constant 0 : index
    %c0_103 = arith.constant 0 : index
    %166 = vector.load %arg15[%c0_102, %c0_103] : memref<1x64xf32, #tpu.memory_space<vmem>>, vector<1x64xf32>
    %167 = vector.broadcast %166 : vector<1x64xf32> to vector<8x64xf32>
    %168 = arith.addf %165, %167 : vector<8x64xf32>
    %cst_104 = arith.constant 0.000000e+00 : f32
    %169 = vector.broadcast %cst_104 : f32 to vector<8x64xf32>
    %170 = arith.maximumf %168, %169 : vector<8x64xf32>
    %171 = arith.truncf %170 : vector<8x64xf32> to vector<8x64xbf16>
    %c0_105 = arith.constant 0 : index
    %c0_106 = arith.constant 0 : index
    %172 = vector.load %arg16[%c0_105, %c0_106] : memref<64x32xbf16, #tpu.memory_space<vmem>>, vector<64x32xbf16>
    %cst_107 = arith.constant dense<0.000000e+00> : vector<8x32xf32>
    %173 = tpu.matmul %171, %172, %cst_107 {dimension_numbers = #tpu.dot_dimension_numbers<[1], [0], [0], [1], [0, 0, 1, 1], [], []>} : vector<8x64xbf16>, vector<64x32xbf16>, vector<8x32xf32> -> vector<8x32xf32>
    %c0_108 = arith.constant 0 : index
    %c0_109 = arith.constant 0 : index
    %174 = vector.load %arg17[%c0_108, %c0_109] : memref<1x32xf32, #tpu.memory_space<vmem>>, vector<1x32xf32>
    %175 = vector.broadcast %174 : vector<1x32xf32> to vector<8x32xf32>
    %176 = arith.addf %173, %175 : vector<8x32xf32>
    %177 = arith.addf %162, %176 : vector<8x32xf32>
    %c0_110 = arith.constant 0 : index
    %c0_111 = arith.constant 0 : index
    %178 = vector.load %arg18[%c0_110, %c0_111] : memref<1x32xf32, #tpu.memory_space<vmem>>, vector<1x32xf32>
    %c0_112 = arith.constant 0 : index
    %c0_113 = arith.constant 0 : index
    %179 = vector.load %arg19[%c0_112, %c0_113] : memref<1x32xf32, #tpu.memory_space<vmem>>, vector<1x32xf32>
    %cst_114 = arith.constant dense<0.000000e+00> : vector<8xf32>
    %180 = vector.multi_reduction <add>, %177, %cst_114 [1] : vector<8x32xf32> to vector<8xf32>
    %181 = vector.shape_cast %180 : vector<8xf32> to vector<8x1xf32>
    %cst_115 = arith.constant 3.200000e+01 : f32
    %182 = vector.broadcast %cst_115 : f32 to vector<8x1xf32>
    %183 = arith.divf %181, %182 : vector<8x1xf32>
    %184 = vector.broadcast %183 : vector<8x1xf32> to vector<8x32xf32>
    %185 = arith.subf %177, %184 : vector<8x32xf32>
    %186 = arith.mulf %185, %185 : vector<8x32xf32>
    %cst_116 = arith.constant dense<0.000000e+00> : vector<8xf32>
    %187 = vector.multi_reduction <add>, %186, %cst_116 [1] : vector<8x32xf32> to vector<8xf32>
    %188 = vector.shape_cast %187 : vector<8xf32> to vector<8x1xf32>
    %cst_117 = arith.constant 3.200000e+01 : f32
    %189 = vector.broadcast %cst_117 : f32 to vector<8x1xf32>
    %190 = arith.divf %188, %189 : vector<8x1xf32>
    %191 = vector.broadcast %183 : vector<8x1xf32> to vector<8x32xf32>
    %192 = arith.subf %177, %191 : vector<8x32xf32>
    %cst_118 = arith.constant 9.99999974E-6 : f32
    %193 = vector.broadcast %cst_118 : f32 to vector<8x1xf32>
    %194 = arith.addf %190, %193 : vector<8x1xf32>
    %195 = math.rsqrt %194 : vector<8x1xf32>
    %196 = vector.broadcast %195 : vector<8x1xf32> to vector<8x32xf32>
    %197 = arith.mulf %192, %196 : vector<8x32xf32>
    %198 = vector.broadcast %178 : vector<1x32xf32> to vector<8x32xf32>
    %199 = arith.mulf %197, %198 : vector<8x32xf32>
    %200 = vector.broadcast %179 : vector<1x32xf32> to vector<8x32xf32>
    %201 = arith.addf %199, %200 : vector<8x32xf32>
    %c0_119 = arith.constant 0 : index
    %c0_120 = arith.constant 0 : index
    %c0_121 = arith.constant 0 : index
    %202 = vector.load %arg20[%c0_119, %c0_120, %c0_121] : memref<1x8x32xf32, #tpu.memory_space<vmem>>, vector<1x8x32xf32>
    %203 = vector.shape_cast %202 : vector<1x8x32xf32> to vector<8x32xf32>
    %204 = vector.shape_cast %201 : vector<8x32xf32> to vector<1x8x32xf32>
    tpu.vector_store %arg20[%c0_119, %c0_120, %c0_121], %204 {strides = array<i32>} : memref<1x8x32xf32, #tpu.memory_space<vmem>>, vector<1x8x32xf32>,
    return
  }
  func.func @transform_0(%arg0: i32, %arg1: i32) -> (i32, i32, i32) {
    %c0_i32 = arith.constant 0 : i32
    %c0_i32_0 = arith.constant 0 : i32
    return %arg0, %arg1, %c0_i32 : i32, i32, i32
  }
  func.func @transform_1(%arg0: i32, %arg1: i32) -> (i32, i32, i32) {
    %c0_i32 = arith.constant 0 : i32
    %c0_i32_0 = arith.constant 0 : i32
    %c0_i32_1 = arith.constant 0 : i32
    return %arg0, %c0_i32, %c0_i32_0 : i32, i32, i32
  }
  func.func @transform_2(%arg0: i32, %arg1: i32) -> (i32, i32, i32) {
    %c0_i32 = arith.constant 0 : i32
    %c0_i32_0 = arith.constant 0 : i32
    %c0_i32_1 = arith.constant 0 : i32
    %c0_i32_2 = arith.constant 0 : i32
    return %c0_i32, %c0_i32_0, %c0_i32_1 : i32, i32, i32
  }
  func.func @transform_3(%arg0: i32, %arg1: i32) -> (i32, i32, i32) {
    %c0_i32 = arith.constant 0 : i32
    %c0_i32_0 = arith.constant 0 : i32
    %c0_i32_1 = arith.constant 0 : i32
    %c0_i32_2 = arith.constant 0 : i32
    return %c0_i32, %c0_i32_0, %c0_i32_1 : i32, i32, i32
  }
  func.func @transform_4(%arg0: i32, %arg1: i32) -> (i32, i32, i32) {
    %c0_i32 = arith.constant 0 : i32
    %c0_i32_0 = arith.constant 0 : i32
    %c0_i32_1 = arith.constant 0 : i32
    %c0_i32_2 = arith.constant 0 : i32
    return %c0_i32, %c0_i32_0, %c0_i32_1 : i32, i32, i32
  }
  func.func @transform_5(%arg0: i32, %arg1: i32) -> (i32, i32, i32) {
    %c0_i32 = arith.constant 0 : i32
    %c0_i32_0 = arith.constant 0 : i32
    %c0_i32_1 = arith.constant 0 : i32
    %c0_i32_2 = arith.constant 0 : i32
    return %c0_i32, %c0_i32_0, %c0_i32_1 : i32, i32, i32
  }
  func.func @transform_6(%arg0: i32, %arg1: i32) -> (i32, i32, i32) {
    %c0_i32 = arith.constant 0 : i32
    %c0_i32_0 = arith.constant 0 : i32
    %c0_i32_1 = arith.constant 0 : i32
    %c0_i32_2 = arith.constant 0 : i32
    return %c0_i32, %c0_i32_0, %c0_i32_1 : i32, i32, i32
  }
  func.func @transform_7(%arg0: i32, %arg1: i32) -> (i32, i32, i32) {
    %c0_i32 = arith.constant 0 : i32
    %c0_i32_0 = arith.constant 0 : i32
    %c0_i32_1 = arith.constant 0 : i32
    %c0_i32_2 = arith.constant 0 : i32
    return %c0_i32, %c0_i32_0, %c0_i32_1 : i32, i32, i32
  }
  func.func @transform_8(%arg0: i32, %arg1: i32) -> (i32, i32, i32) {
    %c0_i32 = arith.constant 0 : i32
    %c0_i32_0 = arith.constant 0 : i32
    %c0_i32_1 = arith.constant 0 : i32
    %c0_i32_2 = arith.constant 0 : i32
    return %c0_i32, %c0_i32_0, %c0_i32_1 : i32, i32, i32
  }
  func.func @transform_9(%arg0: i32, %arg1: i32) -> (i32, i32) {
    %c0_i32 = arith.constant 0 : i32
    %c0_i32_0 = arith.constant 0 : i32
    %c0_i32_1 = arith.constant 0 : i32
    return %c0_i32, %c0_i32_0 : i32, i32
  }
  func.func @transform_10(%arg0: i32, %arg1: i32) -> (i32, i32) {
    %c0_i32 = arith.constant 0 : i32
    %c0_i32_0 = arith.constant 0 : i32
    %c0_i32_1 = arith.constant 0 : i32
    return %c0_i32, %c0_i32_0 : i32, i32
  }
  func.func @transform_11(%arg0: i32, %arg1: i32) -> (i32, i32) {
    %c0_i32 = arith.constant 0 : i32
    %c0_i32_0 = arith.constant 0 : i32
    %c0_i32_1 = arith.constant 0 : i32
    return %c0_i32, %c0_i32_0 : i32, i32
  }
  func.func @transform_12(%arg0: i32, %arg1: i32) -> (i32, i32) {
    %c0_i32 = arith.constant 0 : i32
    %c0_i32_0 = arith.constant 0 : i32
    %c0_i32_1 = arith.constant 0 : i32
    return %c0_i32, %c0_i32_0 : i32, i32
  }
  func.func @transform_13(%arg0: i32, %arg1: i32) -> (i32, i32) {
    %c0_i32 = arith.constant 0 : i32
    %c0_i32_0 = arith.constant 0 : i32
    %c0_i32_1 = arith.constant 0 : i32
    return %c0_i32, %c0_i32_0 : i32, i32
  }
  func.func @transform_14(%arg0: i32, %arg1: i32) -> (i32, i32) {
    %c0_i32 = arith.constant 0 : i32
    %c0_i32_0 = arith.constant 0 : i32
    %c0_i32_1 = arith.constant 0 : i32
    return %c0_i32, %c0_i32_0 : i32, i32
  }
  func.func @transform_15(%arg0: i32, %arg1: i32) -> (i32, i32) {
    %c0_i32 = arith.constant 0 : i32
    %c0_i32_0 = arith.constant 0 : i32
    %c0_i32_1 = arith.constant 0 : i32
    return %c0_i32, %c0_i32_0 : i32, i32
  }
  func.func @transform_16(%arg0: i32, %arg1: i32) -> (i32, i32) {
    %c0_i32 = arith.constant 0 : i32
    %c0_i32_0 = arith.constant 0 : i32
    %c0_i32_1 = arith.constant 0 : i32
    return %c0_i32, %c0_i32_0 : i32, i32
  }
  func.func @transform_17(%arg0: i32, %arg1: i32) -> (i32, i32) {
    %c0_i32 = arith.constant 0 : i32
    %c0_i32_0 = arith.constant 0 : i32
    %c0_i32_1 = arith.constant 0 : i32
    return %c0_i32, %c0_i32_0 : i32, i32
  }
  func.func @transform_18(%arg0: i32, %arg1: i32) -> (i32, i32, i32) {
    %c0_i32 = arith.constant 0 : i32
    %c0_i32_0 = arith.constant 0 : i32
    return %arg0, %arg1, %c0_i32 : i32, i32, i32
  }
}

</mosaic_0001>

<bundles_post_ra>
// kernel: tpu_custom_call.1
= control target key start
LH: loop header
LB: loop body
LE: loop exit
PB: predicated region body
PF: predicated region fallthrough
CT: control target
= control target key end

     0   :  { %s2509_s0 = inlined_call_operand.vmem [shape: f32[2,8,32], index: 0, kind: input, shape index: {}]   ;;  %s2510_s1 = inlined_call_operand.vmem [shape: f32[2,8,32], index: 1, kind: input, shape index: {}]   ;;  %s2511_s2 = inlined_call_operand.vmem [shape: bf16[4,32,8], index: 2, kind: input, shape index: {}]   ;;  %s2512_s3 = inlined_call_operand.vmem [shape: f32[4,1,8], index: 3, kind: input, shape index: {}]   ;;  %s2513_s4 = inlined_call_operand.vmem [shape: bf16[4,32,8], index: 4, kind: input, shape index: {}]   ;;  %s2514_s5 = inlined_call_operand.vmem [shape: f32[4,1,8], index: 5, kind: input, shape index: {}]   ;;  %s2515_s6 = inlined_call_operand.vmem [shape: bf16[4,32,8], index: 6, kind: input, shape index: {}]   ;;  %s2516_s7 = inlined_call_operand.vmem [shape: f32[4,1,8], index: 7, kind: input, shape index: {}]   ;;  %s2517_s8 = inlined_call_operand.vmem [shape: bf16[4,8,32], index: 8, kind: input, shape index: {}]   ;;  %s2518_s9 = inlined_call_operand.vmem [shape: f32[1,32], index: 9, kind: input, shape index: {}]   ;;  %s2519_s10 = inlined_call_operand.vmem [shape: f32[1,32], index: 10, kind: input, shape index: {}]   ;;  %s2520_s11 = inlined_call_operand.vmem [shape: f32[1,32], index: 11, kind: input, shape index: {}]   ;;  %s2521_s12 = inlined_call_operand.vmem [shape: bf16[32,64], index: 12, kind: input, shape index: {}]   ;;  %s2522_s13 = inlined_call_operand.vmem [shape: f32[1,64], index: 13, kind: input, shape index: {}]   ;;  %s2523_s14 = inlined_call_operand.vmem [shape: bf16[64,32], index: 14, kind: input, shape index: {}]   ;;  %s2524_s15 = inlined_call_operand.vmem [shape: f32[1,32], index: 15, kind: input, shape index: {}]   ;;  %s2525_s16 = inlined_call_operand.vmem [shape: f32[1,32], index: 16, kind: input, shape index: {}]   ;;  %s2526_s17 = inlined_call_operand.vmem [shape: f32[1,32], index: 17, kind: input, shape index: {}]   ;;  %s2527_s18 = inlined_call_operand.hbm [shape: f32[2,8,32], index: 18, kind: output, shape index: {}]  }
   0x1   :  { %2538 = sst [smem:[#allocation15_spill]] %s2509_s0 }
   0x2   :  { %2539 = sst [smem:[#allocation16_spill]] %s2510_s1 }
   0x3   :  { %2540 = sst [smem:[#allocation17_spill]] %s2511_s2 }
   0x4   :  { %2541 = sst [smem:[#allocation18_spill]] %s2512_s3 }
   0x5   :  { %2542 = sst [smem:[#allocation19_spill]] %s2526_s17 }
   0x6   :  { %23 = vsyncpa [#allocation5], 0 }
   0x7   :  { %25 = vsyncpa [#allocation5 + $0x1], 0  ;;  %s2160_s27 = smov 0   ;;  %s2162_s28 = smov 0  }
   0x8   :  { %s2164_s29 = smov 0   ;;  %s2166_s30 = smov 0  }
   0x9   :  { %s2168_s0 = smov 0   ;;  %s2170_s19 = smov 0  }
   0xa LB: > { %2543 = sst [smem:[#allocation7_spill]] %s2042_s27  ;;  %s1651_s1 = sadd.s32 4294967295, %s2062_s19   ;;  %s2062_s19 = sphi %s2170_s19, %s31_s19   ;;  %s2058_s0 = sphi %s2168_s0, %s2568_s0   ;;  %s2054_s30 = sphi %s2166_s30, %s2564_s30   ;;  %s2050_s29 = sphi %s2164_s29, %s2563_s29   ;;  %s2046_s28 = sphi %s2162_s28, %s2567_s28   ;;  %s2042_s27 = sphi %s2160_s27, %s2566_s27  }
   0xb   : > { %2544 = sst [smem:[#allocation8_spill]] %s2050_s29  ;;  %s1652_s20 = sadd.s32 4294967294, %s2062_s19  }
   0xc   : > { %2545 = sst [smem:[#allocation9_spill]] %s2058_s0  ;;  %s43_s21 = sadd.s32 1, %s2058_s0 }
   0xd   : > { %2546 = sst [smem:[#allocation10_spill]] %s2062_s19  ;;  %s442_s22 = sadd.s32 1, %s2050_s29 }
   0xe   : > { %p45_p0 = scmp.ge.s32.totalorder %s43_s21, 2  ;;  %p452_p1 = scmp.ne.s32.totalorder %s2050_s29, %s2046_s28 }
   0xf   : > { %p453_p2 = scmp.eq.s32.totalorder %s1651_s1, 1  ;;  %p458_p3 = scmp.ne.s32.totalorder %s2046_s28, %s2042_s27 }
  0x10   : > { %s2570_s21 = smov (%p45_p0, %s43_s21), 0  ;;  %p459_p5 = scmp.eq.s32.totalorder %s1652_s20, 1 }
  0x11   : > { %2547 = sst [smem:[#allocation11_spill]] %s2570_s21  ;;  %p2200_p4 = por %p453_p2, %p452_p1 }
  0x12   : > { %s437_s23 = ssub.s32 %s2058_s0, %s2570_s21  ;;  %p1655_p6 = scmp.ge.s32.totalorder %s2062_s19, 1 }
  0x13   : > { %s2548_s2 = scalar_select %p2200_p4, 1, 0 }
  0x14   : > { %p440_p7 = scmp.eq.s32.totalorder %s437_s23, 0  ;;  %p2207_p8 = por %p459_p5, %p458_p3 }
  0x15   : > { %2549 = sst [smem:[#allocation12_spill]] %s2548_s2  ;;  %p542_p9 = scmp.lt.s32.totalorder %s2062_s19, 3 }
  0x16   : > { %s2550_s24 = scalar_select %p2207_p8, 1, 0 }
  0x17   : > { %s2213_s25 = scalar_select %p440_p7, %s2050_s29, %s442_s22  }
  0x18   : > { %2551 = sst [smem:[#allocation13_spill]] %s2550_s24  ;;  %p543_p10 = pnand %p1655_p6, %p542_p9 }
  0x19   : > { %2552 = sst [smem:[#allocation14_spill]] %s2213_s25  ;;  %p602_p11 = scmp.lt.s32.totalorder (!%p543_p10), %s2054_s30, 1 }
  0x1a   : > { %546 = sbr.rel (%p543_p10) target bundleno = 2080 (0x820), region = 92  ;;  %s2553_s24 = sld [smem:[#allocation16_spill]] (!%p543_p10) }
  0x1b   : > { %s2554_s21 = sld [smem:[#allocation17_spill]] (!%p543_p10)  ;;  %s599_s26 = sand.u32 (!%p543_p10), 1, %s2046_s28  }
  0x1c   : > { %s2556_s3 = sld [smem:[#allocation18_spill]] (!%p543_p10)  ;;  %s1656_s27 = sshll.u32 (!%p543_p10), %s599_s26, 3 }
  0x1d   : > { %s1854_s20 = sshll.u32 (!%p543_p10), %s2054_s30, 3  ;;  %s2558_s25 = sld [smem:[#allocation19_spill]] (!%p543_p10) }
  0x1e   : > { %s1552_s23 = scalar_lea.sflag (!%p543_p10), [#allocation5], %s599_s26 }
  0x1f   : > { %v1864_v0 = vld [vmem:[%s2515_s6 + $0x18] sm:$0xff]  ;;  %v1858_v2 = vld [vmem:[%s2513_s4 + $0x8] sm:$0xff]  ;;  %v1863_v3 = vld [vmem:[%s2515_s6 + $0x10] sm:$0xff]  ;;  %s2232_s1 = scalar_select %p602_p11, %s2054_s30, 1  ;;  %vm641_vm0 = vcmask 261120   ;;  %vm692_vm1 = vcmask 60416  }
  0x20   : > { %v1862_v1 = vld [vmem:[%s2513_s4 + $0x18] sm:$0xff]  ;;  %759 = vmatpush.bf16.msra.mxu3 %v1864_v0  ;;  %v1861_v4 = vld [vmem:[%s2513_s4 + $0x10] sm:$0xff]  ;;  %651 = vmatpush.bf16.msra.mxu0 %v1858_v2  ;;  %v1857_v6 = vld [vmem:[%s2513_s4] sm:$0xff]  ;;  %vm966_vm2 = vcmask 64512   ;;  %vm1001_vm3 = vcmask 1043456   ;;  %vm1500_vm8 = vcmask 523264  }
  0x21   : > { %724 = vmatpush.bf16.msra.mxu2 %v1862_v1  ;;  %v1872_v5 = vld [vmem:[%s2515_s6 + $0x38] sm:$0xff]  ;;  %s1657_s29 = sshll.u32 %s2232_s1, 3  ;;  %v1866_v7 = vld [vmem:[%s2513_s4 + $0x28] sm:$0xff]  ;;  %v1871_v8 = vld [vmem:[%s2515_s6 + $0x30] sm:$0xff] }
  0x22   : > { %s612_s19 = scalar_lea.vmem %s2553_s24, %s1657_s29  ;;  %v1876_v10 = vld [vmem:[%s2554_s21 + $0x18] sm:$0xff]  ;;  %v1865_v11 = vld [vmem:[%s2513_s4 + $0x20] sm:$0xff]  ;;  %v1874_v13 = vld [vmem:[%s2554_s21 + $0x8] sm:$0xff] }
  0x23   : > { %v619_v9 = vld [vmem:[%s612_s19] sm:$0xff]  ;;  %v1860_v14 = vld [vmem:[%s2515_s6 + $0x8] sm:$0xff]  ;;  %v1875_v15 = vld [vmem:[%s2554_s21 + $0x10] sm:$0xff]  ;;  %s2555_s19 = sld [smem:[#allocation15_spill]] }
  0x24   : > { %760 = vmatpush.bf16.msra.mxu3 %v1863_v3  ;;  %v2258_v12 = vpack.c.bf16 %v619_v9, %v619_v9  ;;  %652 = vmatpush.bf16.msra.mxu0 %v1857_v6  ;;  %v1873_v16 = vld [vmem:[%s2554_s21] sm:$0xff]  ;;  %v1868_v20 = vld [vmem:[%s2515_s6 + $0x28] sm:$0xff] }
  0x25   : > { %725 = vmatpush.bf16.msra.mxu2 %v1861_v4  ;;  %684 = vmatpush.bf16.msra.mxu1 %v1860_v14  ;;  %v1859_v17 = vld [vmem:[%s2515_s6] sm:$0xff]  ;;  %v1870_v14 = vld [vmem:[%s2513_s4 + $0x38] sm:$0xff] }
  0x26   : > { %v1867_v21 = vld [vmem:[%s2515_s6 + $0x20] sm:$0xff] }
  0x27   : > { %1704 = vmatmul.msk.bf16.vlgmr.msra.gmra.mxu3 %vm641_vm0, %v2258_v12  ;;  %1667 = vmatmul.msk.bf16.vlgmr.msra.gmra.mxu0 %vm641_vm0, %v2258_v12  ;;  %v1943_v22 = vld [vmem:[%s2514_s5] ss:$0 sm:$0xff]  ;;  %v1944_v25 = vld [vmem:[%s2516_s7 + $0x1] ss:$0 sm:$0xff]  ;;  %v1946_v39 = vld [vmem:[%s2514_s5 + $0x2] ss:$0 sm:$0xff] }
  0x28   : > { %911 = vmatpush.bf16.msrb.mxu3 %v1872_v5  ;;  %800 = vmatpush.bf16.msrb.mxu0 %v1866_v7  ;;  %v1945_v26 = vld [vmem:[%s2514_s5 + $0x1] ss:$0 sm:$0xff]  ;;  %v1950_v40 = vld [vmem:[%s2516_s7] ss:$0 sm:$0xff]  ;;  %v1947_v48 = vld [vmem:[%s2516_s7 + $0x3] ss:$0 sm:$0xff] }
  0x29   : > { %1690 = vmatmul.msk.bf16.vlgmr.msra.gmra.mxu2 %vm641_vm0, %v2258_v12  ;;  %685 = vmatpush.bf16.msra.mxu1 %v1859_v17  ;;  %s608_s2 = scalar_lea.vmem %s2555_s19, %s1657_s29  ;;  %v1948_v58 = vld [vmem:[%s2556_s3] ss:$0 sm:$0xff]  ;;  %v1949_v61 = vld [vmem:[%s2556_s3 + $0x1] ss:$0 sm:$0xff]  ;;  %s601_s29 = scalar_lea.vmem [#allocation4], %s1656_s27 }
  0x2a   : > { %v2292_v18 = vld [vmem:[%s608_s2] sm:$0xff]  ;;  %876 = vmatpush.bf16.msrb.mxu2 %v1870_v14  ;;  %s1563_s2 = scalar_lea.hbm %s2527_s18, %s1854_s20  ;;  %s1565_s30 = sshll.u32 %s601_s29, 4  ;;  %s1566_s30 = int_to_ptr.vmem [resolvable:$true] %s1565_s30 }
  0x2b   : > { %v2296_v19 = vpack.c.bf16 %v2292_v18, %v2292_v18  ;;  %s2004_s27 = scalar_lea.hbm %s2527_s18, 16 }
  0x2c   : > { %912 = vmatpush.bf16.msrb.mxu3 %v1871_v8  ;;  %801 = vmatpush.bf16.msrb.mxu0 %v1865_v11  ;;  %v1951_v8 = vld [vmem:[%s2516_s7 + $0x2] ss:$0 sm:$0xff] }
  0x2d   : > { %1676 = vmatmul.msk.bf16.vlgmr.msra.gmra.mxu1 %vm641_vm0, %v2258_v12 }
  0x2e   : > { %835 = vmatpush.bf16.msrb.mxu1 %v1868_v20 }
  0x30   : > { %1048 = vmatpush.bf16.msra.mxu3 %v1876_v10  ;;  %955 = vmatpush.bf16.msra.mxu0 %v1874_v13 }
  0x32   : > { %836 = vmatpush.bf16.msrb.mxu1 %v1867_v21 }
  0x34   : > { %1049 = vmatpush.bf16.msra.mxu3 %v1875_v15  ;;  %956 = vmatpush.bf16.msra.mxu0 %v1873_v16 }
  0x37   : > { %1760 = vmatmul.msk.bf16.vlgmr.msrb.gmra.mxu3 %vm641_vm0, %v2258_v12  ;;  %1718 = vmatmul.msk.bf16.vlgmr.msrb.gmra.mxu0 %vm641_vm0, %v2258_v12 }
  0x3d   : > { %1732 = vmatmul.msk.bf16.vlgmr.msrb.gmra.mxu1 %vm641_vm0, %v2258_v12 }
  0x47   : > { %1785 = vmatmul.msk.bf16.vlgmr.msra.gmra.mxu3 %vm641_vm0, %v2296_v19  ;;  %1769 = vmatmul.msk.bf16.vlgmr.msra.gmra.mxu0 %vm641_vm0, %v2296_v19 }
  0xa4   : > { %v654_v23 = vpop.f32.mrf.mxu0 }
  0xa5   : > { %v655_v24 = vadd.f32 %v1943_v22, %v654_v23  ;;  %v1869_v23 = vld [vmem:[%s2513_s4 + $0x30] sm:$0xff] }
  0xa6   : > { %877 = vmatpush.bf16.msrb.mxu2 %v1869_v23 }
  0xa7   : > { %v691_v27 = vpack.c.bf16 %v655_v24, %v655_v24  ;;  %v1878_v24 = vld [vmem:[%s2554_s21 + $0x28] sm:$0xff] }
  0xa9   : > { %693 = vst.msk [vmem:[#allocation2] sm:$0xf] %vm692_vm1, %v691_v27  ;;  %1746 = vmatmul.msk.bf16.vlgmr.msrb.gmra.mxu2 %vm641_vm0, %v2258_v12  ;;  %v1879_v12 = vld [vmem:[%s2554_s21 + $0x30] sm:$0xff] }
  0xaa   : > { %v762_v28 = vpop.f32.mrf.mxu3  ;;  %v687_v41 = vpop.f32.mrf.mxu1 }
  0xab   : > { %v763_v30 = vadd.f32 %v1944_v25, %v762_v28  ;;  %v688_v42 = vadd.f32 %v1950_v40, %v687_v41  ;;  %v1877_v25 = vld [vmem:[%s2554_s21 + $0x20] sm:$0xff] }
  0xac   : > { %v727_v29 = vpop.f32.mrf.mxu2  ;;  %v656_v34 = vpop.f32.mrf.mxu0 }
  0xad   : > { %v728_v31 = vadd.f32 %v1945_v26, %v727_v29  ;;  %v769_v32 = vpack.c.bf16 %v763_v30, %v763_v30  ;;  %v694_v46 = vpack.c.bf16 %v688_v42, %v688_v42  ;;  %v1880_v26 = vld [vmem:[%s2554_s21 + $0x38] sm:$0xff] }
  0xaf   : > { %v766_v33 = vpack.c.bf16 %v728_v31, %v728_v31  ;;  %771 = vst.msk [vmem:[#allocation3 + $0x4] sm:$0xf] %vm692_vm1, %v769_v32  ;;  %v1952_v32 = vld [vmem:[%s2514_s5 + $0x3] ss:$0 sm:$0xff] }
  0xb0   : > { %v963_v35 = vld [vmem:[#allocation2] sm:$0xf]  ;;  %695 = vst.msk [vmem:[#allocation3] sm:$0xf] %vm692_vm1, %v694_v46 }
  0xb1   : > { %768 = vst.msk [vmem:[#allocation2 + $0x4] sm:$0xf] %vm692_vm1, %v766_v33  ;;  %v971_v38 = vsel %vm966_vm2, %v963_v35, 0  ;;  %v1953_v46 = vld [vmem:[%s2556_s3 + $0x2] ss:$0 sm:$0xff] }
  0xb2   : > { %v764_v36 = vpop.f32.mrf.mxu3  ;;  %980 = vmatpush.bf16.xpose.msra.mxu1 %v971_v38  ;;  %v689_v54 = vpop.f32.mrf.mxu1 }
  0xb4   : > { %v729_v37 = vpop.f32.mrf.mxu2  ;;  %v803_v43 = vpop.f32.mrf.mxu0 }
  0xb5   : > { %v804_v45 = vadd.f32 %v1946_v39, %v803_v43 }
  0xb6   : > { %v1059_v44 = vld [vmem:[#allocation3 + $0x4] sm:$0xf] }
  0xb7   : > { %v1096_v47 = vsel %vm1001_vm3, %v1059_v44, 0  ;;  %v842_v50 = vpack.c.bf16 %v804_v45, %v804_v45 }
  0xb8   : > { %v1057_v49 = vld [vmem:[#allocation2 + $0x4] sm:$0xf] }
  0xb9   : > { %v1065_v51 = vsel %vm966_vm2, %v1057_v49, 0  ;;  %844 = vst.msk [vmem:[#allocation2 + $0x8] sm:$0xf] %vm692_vm1, %v842_v50 }
  0xba   : > { %1105 = vmatpush.bf16.msrb.mxu1 %v1096_v47  ;;  %1074 = vmatpush.bf16.xpose.msrb.mxu0 %v1065_v51  ;;  %v914_v52 = vpop.f32.mrf.mxu3  ;;  %v838_v9 = vpop.f32.mrf.mxu1  ;;  %v964_v47 = vld [vmem:[#allocation3] sm:$0xf] }
  0xbb   : > { %v915_v53 = vadd.f32 %v1947_v48, %v914_v52  ;;  %v839_v10 = vadd.f32 %v1951_v8, %v838_v9  ;;  %v1003_v48 = vsel %vm1001_vm3, %v964_v47, 0  ;;  %v1954_v52 = vld [vmem:[%s2556_s3 + $0x3] ss:$0 sm:$0xff]  ;;  %s1567_s3 = sshll.u32 %s1563_s2, 4  ;;  %s1568_s3 = int_to_ptr.hbm [resolvable:$true] %s1567_s3 }
  0xbc   : > { %v805_v56 = vpop.f32.mrf.mxu0  ;;  %1012 = vmatpush.bf16.msra.mxu2 %v1003_v48  ;;  %s1998_s0 = sshra.s32 %s1568_s3, 4  ;;  %s1999_s0 = int_to_ptr.hbm [resolvable:$true] %s1998_s0 }
  0xbd   : > { %v921_v55 = vpack.c.bf16 %v915_v53, %v915_v53  ;;  %v845_v11 = vpack.c.bf16 %v839_v10, %v839_v10  ;;  %s2000_s20 = scalar_lea.hbm %s1999_s0, 8  ;;  %p2005_p1 = scmp.lt.s32.totalorder %s1999_s0, %s2527_s18 }
  0xbe   : > { %p2001_p12 = scmp.ne.s32.totalorder %s1999_s0, %s2000_s20  ;;  %p2006_p2 = scmp.lt.s32.totalorder %s2004_s27, %s2000_s20 }
  0xbf   : > { %923 = vst.msk [vmem:[#allocation3 + $0xc] sm:$0xf] %vm692_vm1, %v921_v55 }
  0xc0   : > { %v1189_v62 = vld [vmem:[#allocation2 + $0x8] sm:$0xf]  ;;  %847 = vst.msk [vmem:[#allocation3 + $0x8] sm:$0xf] %vm692_vm1, %v845_v11  ;;  %p2002_p13 = pnand %p2001_p12, %p2200_p4  ;;  %p2007_p3 = por %p2006_p2, %p2005_p1 }
  0xc1   : > { %v1197_v2 = vsel %vm966_vm2, %v1189_v62, 0 }
  0xc2   : > { %v916_v57 = vpop.f32.mrf.mxu3  ;;  %v840_v13 = vpop.f32.mrf.mxu1  ;;  %1180 = vmatpush.bf16.msra.mxu0 %v1878_v24  ;;  %p2003_p0 = pneg %p2002_p13 }
  0xc4   : > { %v958_v59 = vpop.f32.mrf.mxu0  ;;  %p2008_p5 = pnand %p2007_p3, %p2003_p0 }
  0xc5   : > { %v959_v60 = vadd.f32 %v1948_v58, %v958_v59 }
  0xc6   : > { %1181 = vmatpush.bf16.msra.mxu0 %v1877_v25 }
  0xc7   : > { %v962_v63 = vmul.f32 0.35355338, %v959_v60  ;;  %v1191_v23 = vld [vmem:[#allocation3 + $0x8] sm:$0xf] }
  0xc8   : > { %v1228_v25 = vsel %vm1001_vm3, %v1191_v23, 0 }
  0xc9   : > { %v965_v0 = vpack.c.bf16 %v962_v63, %v962_v63 }
  0xca   : > { %v1051_v1 = vpop.f32.mrf.mxu3 }
  0xcb   : > { %v1052_v3 = vadd.f32 %v1949_v61, %v1051_v1  ;;  %1770 = vmatmul.msk.bf16.vlgmr.msra.gmra.mxu1 %vm966_vm2, %v965_v0 }
  0xcc   : > { %1206 = vmatpush.bf16.xpose.msra.mxu1 %v1197_v2  ;;  %v960_v5 = vpop.f32.mrf.mxu0 }
  0xcd   : > { %v1055_v4 = vmul.f32 0.35355338, %v1052_v3 }
  0xcf   : > { %v1060_v6 = vpack.c.bf16 %v1055_v4, %v1055_v4 }
  0xd1   : > { %1786 = vmatmul.msk.bf16.vlgmr.msrb.gmra.mxu0 %vm966_vm2, %v1060_v6 }
  0xd2   : > { %v1053_v7 = vpop.f32.mrf.mxu3  ;;  %1294 = vmatpush.bf16.msrb.mxu0 %v1880_v26  ;;  %v1305_v26 = vld [vmem:[#allocation3 + $0xc] sm:$0xf] }
  0xd3   : > { %v1788_v7 = vld [vmem:[%s2517_s8 + $0x4] sm:$0xf] }
  0xd4   : > { %v1118_v8 = vsel %vm1001_vm3, %v1788_v7, 0 }
  0xd5   : > { %1127 = vmatpush.bf16.msrb.mxu2 %v1118_v8 }
  0xd6   : > { %1295 = vmatpush.bf16.msrb.mxu0 %v1879_v12 }
  0xe1   : > { %1804 = vmatmul.msk.bf16.vlgmr.msra.gmra.mxu0 %vm641_vm0, %v2296_v19 }
  0xf1   : > { %1822 = vmatmul.msk.bf16.vlgmr.msrb.gmra.mxu0 %vm641_vm0, %v2296_v19 }
 0x12c   : > { %v879_v33 = vpop.f32.mrf.mxu2 }
 0x12d   : > { %v880_v34 = vadd.f32 %v1952_v32, %v879_v33 }
 0x12f   : > { %v918_v36 = vpack.c.bf16 %v880_v34, %v880_v34 }
 0x131   : > { %920 = vst.msk [vmem:[#allocation2 + $0xc] sm:$0xf] %vm692_vm1, %v918_v36 }
 0x134   : > { %v881_v37 = vpop.f32.mrf.mxu2 }
 0x138   : > { %v1303_v42 = vld [vmem:[#allocation2 + $0xc] sm:$0xf] }
 0x139   : > { %v1311_v45 = vsel %vm966_vm2, %v1303_v42, 0 }
 0x148   : > { %v2353_v15 = vpop.f32.mrf.mxu1 }
 0x149   : > { %v986_v16 = vsel %vm966_vm2, %v2353_v15, -inf }
 0x14a   : > { %987 = vmax.xlane.f32.xlu1 %v986_v16 }
 0x14e   : > { %v1076_v17 = vpop.f32.mrf.mxu0 }
 0x14f   : > { %v1080_v20 = vsel %vm966_vm2, %v1076_v17, -inf }
 0x150   : > { %1081 = vmax.xlane.f32.xlu0 %v1080_v20  ;;  %v984_v21 = vpop.f32.mrf.mxu1 }
 0x156   : > { %v1078_v22 = vpop.f32.mrf.mxu0 }
 0x15e   : > { %v1183_v35 = vpop.f32.mrf.mxu0 }
 0x15f   : > { %v1184_v49 = vadd.f32 %v1953_v46, %v1183_v35 }
 0x161   : > { %v1187_v50 = vmul.f32 0.35355338, %v1184_v49 }
 0x163   : > { %v1192_v51 = vpack.c.bf16 %v1187_v50, %v1187_v50 }
 0x166   : > { %v1185_v19 = vpop.f32.mrf.mxu0 }
 0x167   : > { %v1807_v19 = vld [vmem:[%s2517_s8 + $0x8] sm:$0xf] }
 0x16e   : > { %v1297_v38 = vpop.f32.mrf.mxu0 }
 0x16f   : > { %v1298_v53 = vadd.f32 %v1954_v52, %v1297_v38  ;;  %v1250_v38 = vsel %vm1001_vm3, %v1807_v19, 0 }
 0x171   : > { %v1301_v54 = vmul.f32 0.35355338, %v1298_v53 }
 0x173   : > { %v1306_v55 = vpack.c.bf16 %v1301_v54, %v1301_v54 }
 0x176   : > { %v1299_v40 = vpop.f32.mrf.mxu0 }
 0x1bd   : > { %v988_v60 = vpop.xlane.xlu1 %987 }
 0x1be   : > { %v989_v61 = vsub.f32 %v2353_v15, %v988_v60 }
 0x1c0   : > { %v990_v63 = vmul.f32 1.442695, %v989_v61 }
 0x1c3   : > { %v1082_v27 = vpop.xlane.xlu0 %1081 }
 0x1c4   : > { %v1083_v28 = vsub.f32 %v1076_v17, %v1082_v27  ;;  %v1342_v27 = vsel %vm1001_vm3, %v1305_v26, 0 }
 0x1c6   : > { %v1084_v29 = vmul.f32 1.442695, %v1083_v28 }
 0x1c8   : > { %1962 = vpow2.f32 %v1084_v29  ;;  %v1019_v29 = vld [vmem:[%s2517_s8] sm:$0xf] }
 0x1ce   : > { %v1963_v30 = vpop.eup %1962 }
 0x1cf   : > { %v1086_v31 = vsel %vm966_vm2, %v1963_v30, 0.0 }
 0x1d0   : > { %1087 = vadd.xlane.f32.xlu0 %v1086_v31  ;;  %v1137_v31 = vsel %vm1001_vm3, %v1019_v29, 0 }
 0x1d1   : > { %1146 = vmatpush.bf16.msrb.mxu3 %v1137_v31 }
 0x1d5   : > { %1259 = vmatpush.bf16.msra.mxu3 %v1250_v38 }
 0x243   : > { %v1088_v39 = vpop.xlane.xlu0 %1087 }
 0x244   : > { %1964 = vrcp.f32 %v1088_v39 }
 0x245   : > { %1966 = vpow2.f32 %v990_v63 }
 0x24a   : > { %v1965_v41 = vpop.eup %1964 }
 0x24b   : > { %v1090_v43 = vmul.f32 %v1965_v41, %v1963_v30  ;;  %v1967_v2 = vpop.eup %1966 }
 0x24c   : > { %v992_v4 = vsel %vm966_vm2, %v1967_v2, 0.0 }
 0x24d   : > { %v1091_v44 = vpack.c.bf16 %v1090_v43, %v1090_v43 }
 0x24f   : > { %1787 = vmatmul.msk.bf16.vlgmr.msrb.gmra.mxu1 %vm966_vm2, %v1091_v44  ;;  %v1825_v44 = vld [vmem:[%s2517_s8 + $0xc] sm:$0xf] }
 0x250   : > { %1320 = vmatpush.bf16.xpose.msrb.mxu1 %v1311_v45  ;;  %v1364_v45 = vsel %vm1001_vm3, %v1825_v44, 0 }
 0x25f   : > { %1805 = vmatmul.msk.bf16.vlgmr.msra.gmra.mxu1 %vm966_vm2, %v1192_v51 }
 0x26f   : > { %1823 = vmatmul.msk.bf16.vlgmr.msrb.gmra.mxu1 %vm966_vm2, %v1306_v55 }
 0x2cc   : > { %v1107_v56 = vpop.f32.mrf.mxu1 }
 0x2cd   : > { %v1111_v12 = vpack.c.bf16 %v1107_v56, %v1107_v56 }
 0x2d4   : > { %v1109_v57 = vpop.f32.mrf.mxu1 }
 0x2dc   : > { %v1208_v58 = vpop.f32.mrf.mxu1 }
 0x2dd   : > { %v1212_v59 = vsel %vm966_vm2, %v1208_v58, -inf }
 0x2de   : > { %1213 = vmax.xlane.f32.xlu1 %v1212_v59 }
 0x2e4   : > { %v1210_v62 = vpop.f32.mrf.mxu1 }
 0x2ec   : > { %v1322_v0 = vpop.f32.mrf.mxu1 }
 0x2ed   : > { %v1326_v1 = vsel %vm966_vm2, %v1322_v0, -inf }
 0x2ee   : > { %1327 = vmax.xlane.f32.xlu2 %v1326_v1  ;;  %v2064_v1 = vmov 32.0  }
 0x2f4   : > { %v1324_v3 = vpop.f32.mrf.mxu1 }
 0x2f6   : > { %993 = vadd.xlane.f32.xlu2 %v992_v4 }
 0x351   : > { %v1214_v5 = vpop.xlane.xlu1 %1213 }
 0x352   : > { %v1215_v6 = vsub.f32 %v1208_v58, %v1214_v5  ;;  %v1955_v58 = vld [vmem:[%s2518_s9] ss:$0 sm:$0xff] }
 0x354   : > { %v1216_v9 = vmul.f32 1.442695, %v1215_v6 }
 0x356   : > { %1968 = vpow2.f32 %v1216_v9 }
 0x35c   : > { %v1969_v10 = vpop.eup %1968 }
 0x35d   : > { %v1218_v11 = vsel %vm966_vm2, %v1969_v10, 0.0 }
 0x35e   : > { %1219 = vadd.xlane.f32.xlu0 %v1218_v11 }
 0x361   : > { %v1328_v13 = vpop.xlane.xlu2 %1327 }
 0x362   : > { %v1329_v14 = vsub.f32 %v1322_v0, %v1328_v13 }
 0x364   : > { %v1330_v15 = vmul.f32 1.442695, %v1329_v14  ;;  %v1881_v14 = vld [vmem:[%s2521_s12] sm:$0xff] }
 0x366   : > { %1970 = vpow2.f32 %v1330_v15  ;;  %v1886_v15 = vld [vmem:[%s2523_s14 + $0x18] sm:$0xff] }
 0x367   : > { %1508 = vmatpush.bf16.msra.mxu1 %v1886_v15 }
 0x369   : > { %v994_v16 = vpop.xlane.xlu2 %993 }
 0x36a   : > { %1972 = vrcp.f32 %v994_v16 }
 0x36c   : > { %v1971_v17 = vpop.eup %1970 }
 0x36d   : > { %v1332_v20 = vsel %vm966_vm2, %v1971_v17, 0.0 }
 0x36e   : > { %1333 = vadd.xlane.f32.xlu1 %v1332_v20  ;;  %v1885_v20 = vld [vmem:[%s2523_s14 + $0x10] sm:$0xff] }
 0x36f   : > { %1509 = vmatpush.bf16.msra.mxu1 %v1885_v20 }
 0x370   : > { %v1973_v21 = vpop.eup %1972 }
 0x371   : > { %v996_v22 = vmul.f32 %v1973_v21, %v1967_v2 }
 0x373   : > { %v997_v24 = vpack.c.bf16 %v996_v22, %v996_v22  ;;  %v1884_v22 = vld [vmem:[%s2523_s14 + $0x8] sm:$0xff] }
 0x374   : > { %1510 = vmatpush.bf16.msra.mxu1 %v1884_v22 }
 0x375   : > { %1771 = vmatmul.msk.bf16.vlgmr.msra.gmra.mxu2 %vm966_vm2, %v997_v24 }
 0x376   : > { %1237 = vmatpush.bf16.msra.mxu2 %v1228_v25 }
 0x385   : > { %1789 = vmatmul.msk.bf16.vlgmr.msrb.gmra.mxu2 %vm966_vm2, %v1111_v12 }
 0x386   : > { %1351 = vmatpush.bf16.msrb.mxu2 %v1342_v27 }
 0x3d1   : > { %v1220_v28 = vpop.xlane.xlu0 %1219 }
 0x3d2   : > { %1974 = vrcp.f32 %v1220_v28  ;;  %v1956_v28 = vld [vmem:[%s2519_s10] ss:$0 sm:$0xff] }
 0x3d8   : > { %v1975_v30 = vpop.eup %1974 }
 0x3d9   : > { %v1222_v32 = vmul.f32 %v1975_v30, %v1969_v10  ;;  %v1957_v30 = vld [vmem:[%s2520_s11] ss:$0 sm:$0xff] }
 0x3db   : > { %v1223_v33 = vpack.c.bf16 %v1222_v32, %v1222_v32 }
 0x3dd   : > { %1806 = vmatmul.msk.bf16.vlgmr.msra.gmra.mxu2 %vm966_vm2, %v1223_v33 }
 0x3e1   : > { %v1334_v34 = vpop.xlane.xlu1 %1333 }
 0x3e2   : > { %1976 = vrcp.f32 %v1334_v34 }
 0x3e3   : > { %1978 = vrcp.f32 %v2064_v1 }
 0x3e8   : > { %v1977_v35 = vpop.eup %1976 }
 0x3e9   : > { %v1336_v36 = vmul.f32 %v1977_v35, %v1971_v17  ;;  %v1979_v2 = vpop.eup %1978  ;;  %v1883_v35 = vld [vmem:[%s2523_s14] sm:$0xff] }
 0x3ea   : > { %v1392_v3 = vmul.f32 32.0, %v1979_v2  ;;  %vm1396_vm4 = vweird.f32 %v1979_v2  ;;  %1511 = vmatpush.bf16.msra.mxu1 %v1883_v35 }
 0x3eb   : > { %v1337_v37 = vpack.c.bf16 %v1336_v36, %v1336_v36  ;;  %v1958_v36 = vld [vmem:[%s2522_s13] ss:$0 sm:$0xff] }
 0x3ec   : > { %v1393_v4 = vsub.f32 1.0, %v1392_v3 }
 0x3ed   : > { %1824 = vmatmul.msk.bf16.vlgmr.msrb.gmra.mxu2 %vm966_vm2, %v1337_v37 }
 0x3ee   : > { %v1394_v5 = vmul.f32 %v1979_v2, %v1393_v4 }
 0x3f0   : > { %v1395_v6 = vadd.f32 %v1979_v2, %v1394_v5 }
 0x3f2   : > { %v1397_v7 = vsel %vm1396_vm4, %v1979_v2, %v1395_v6 }
 0x3f8   : > { %v1014_v39 = vpop.f32.mrf.mxu2 }
 0x3f9   : > { %v1018_v40 = vpack.c.bf16 %v1014_v39, %v1014_v39 }
 0x3fb   : > { %1790 = vmatmul.msk.bf16.vlgmr.msrb.gmra.mxu3 %vm966_vm2, %v1018_v40 }
 0x3fc   : > { %1373 = vmatpush.bf16.msrb.mxu3 %v1364_v45 }
 0x400   : > { %v1016_v41 = vpop.f32.mrf.mxu2 }
 0x401   : > { %v1959_v41 = vld [vmem:[%s2524_s15] ss:$0 sm:$0xff] }
 0x408   : > { %v1129_v42 = vpop.f32.mrf.mxu2 }
 0x410   : > { %v1131_v43 = vpop.f32.mrf.mxu2 }
 0x460   : > { %v1239_v46 = vpop.f32.mrf.mxu2 }
 0x461   : > { %v1243_v47 = vpack.c.bf16 %v1239_v46, %v1239_v46 }
 0x463   : > { %1808 = vmatmul.msk.bf16.vlgmr.msra.gmra.mxu3 %vm966_vm2, %v1243_v47 }
 0x468   : > { %v1241_v48 = vpop.f32.mrf.mxu2 }
 0x470   : > { %v1353_v49 = vpop.f32.mrf.mxu2 }
 0x471   : > { %v1357_v50 = vpack.c.bf16 %v1353_v49, %v1353_v49 }
 0x473   : > { %1826 = vmatmul.msk.bf16.vlgmr.msrb.gmra.mxu3 %vm966_vm2, %v1357_v50 }
 0x478   : > { %v1355_v51 = vpop.f32.mrf.mxu2 }
 0x47e   : > { %v1148_v52 = vpop.f32.mrf.mxu3 }
 0x47f   : > { %v1149_v56 = vadd.f32 %v1148_v52, %v1129_v42 }
 0x486   : > { %v1150_v53 = vpop.f32.mrf.mxu3 }
 0x4e6   : > { %v1261_v54 = vpop.f32.mrf.mxu3 }
 0x4e7   : > { %v1265_v57 = vadd.f32 %v1261_v54, %v1149_v56 }
 0x4ee   : > { %v1263_v55 = vpop.f32.mrf.mxu3 }
 0x4f6   : > { %v1375_v59 = vpop.f32.mrf.mxu3 }
 0x4f7   : > { %v1379_v60 = vadd.f32 %v1375_v59, %v1265_v57 }
 0x4f9   : > { %v1384_v61 = vadd.f32 %v1955_v58, %v1379_v60 }
 0x4fb   : > { %v1385_v62 = vadd.f32 %v1384_v61, %v2292_v18  ;;  %v1882_v18 = vld [vmem:[%s2521_s12 + $0x8] sm:$0xff]  ;;  %v1960_v61 = vld [vmem:[%s2525_s16] ss:$0 sm:$0xff] }
 0x4fc   : > { %1455 = vmatpush.bf16.msra.mxu0 %v1882_v18 }
 0x4fd   : > { %v1388_v63 = vsel %vm641_vm0, %v1385_v62, 0.0 }
 0x4fe   : > { %1389 = vadd.xlane.f32.xlu2 %v1388_v63  ;;  %v1377_v0 = vpop.f32.mrf.mxu3 }
 0x4ff   : > { %v1961_v0 = vld [vmem:[%s2558_s25] ss:$0 sm:$0xff] }
 0x500   : > { %1456 = vmatpush.bf16.msra.mxu0 %v1881_v14 }
 0x571   : > { %v1390_v8 = vpop.xlane.xlu2 %1389 }
 0x572   : > { %v1398_v9 = vmul.f32 %v1397_v7, %v1390_v8 }
 0x574   : > { %v1399_v10 = vsub.f32 %v1385_v62, %v1398_v9 }
 0x576   : > { %v1400_v11 = vmul.f32 %v1399_v10, %v1399_v10 }
 0x578   : > { %v1401_v13 = vsel %vm641_vm0, %v1400_v11, 0.0 }
 0x579   : > { %1402 = vadd.xlane.f32.xlu0 %v1401_v13 }
 0x5ec   : > { %v1403_v16 = vpop.xlane.xlu0 %1402 }
 0x5ed   : > { %v1404_v17 = vmul.f32 %v1403_v16, %v1397_v7 }
 0x5ef   : > { %v1405_v21 = vadd.f32 1e-05, %v1404_v17 }
 0x5f1   : > { %1980 = vrsqrt.f32 %v1405_v21  ;;  %vm1412_vm6 = vweird.f32 %v1405_v21 }
 0x5f7   : > { %v1981_v23 = vpop.eup %1980 }
 0x5f8   : > { %v1407_v24 = vmul.f32 %v1981_v23, %v1405_v21  ;;  %vm1413_vm5 = vweird.f32 %v1981_v23 }
 0x5f9   : > { %vm1414_vm7 = vmor %vm1412_vm6, %vm1413_vm5 }
 0x5fa   : > { %v1408_v25 = vmul.f32 %v1981_v23, %v1407_v24 }
 0x5fc   : > { %v1409_v26 = vmul.f32 0.5, %v1408_v25 }
 0x5fe   : > { %v1410_v12 = vsub.f32 1.5, %v1409_v26 }
 0x600   : > { %v1411_v27 = vmul.f32 %v1981_v23, %v1410_v12 }
 0x602   : > { %v1415_v29 = vsel %vm1414_vm7, %v1981_v23, %v1411_v27 }
 0x603   : > { %v1416_v31 = vmul.f32 %v1415_v29, %v1399_v10 }
 0x605   : > { %v1420_v32 = vmul.f32 %v1956_v28, %v1416_v31 }
 0x607   : > { %v1424_v33 = vadd.f32 %v1957_v30, %v1420_v32 }
 0x609   : > { %v1425_v34 = vpack.c.bf16 %v1424_v33, %v1424_v33 }
 0x60b   : > { %1835 = vmatmul.msk.bf16.vlgmr.msra.gmra.mxu0 %vm641_vm0, %v1425_v34 }
 0x688   : > { %v1458_v37 = vpop.f32.mrf.mxu0 }
 0x689   : > { %v1459_v19 = vadd.f32 %v1958_v36, %v1458_v37 }
 0x68b   : > { %v1462_v38 = vmax.f32 %v1459_v19, 0.0 }
 0x68d   : > { %v1463_v39 = vpack.c.bf16 %v1462_v38, %v1462_v38 }
 0x68f   : > { %1852 = vmatmul.msk.bf16.vlgmr.msra.gmra.mxu1 %vm1500_vm8, %v1463_v39 }
 0x690   : > { %v1460_v40 = vpop.f32.mrf.mxu0 }
 0x70c   : > { %v1513_v42 = vpop.f32.mrf.mxu1 }
 0x70d   : > { %v1514_v43 = vadd.f32 %v1959_v41, %v1513_v42 }
 0x70f   : > { %v1517_v44 = vadd.f32 %v1514_v43, %v1424_v33 }
 0x711   : > { %v1520_v45 = vsel %vm641_vm0, %v1517_v44, 0.0 }
 0x712   : > { %1521 = vadd.xlane.f32.xlu1 %v1520_v45 }
 0x714   : > { %v1515_v46 = vpop.f32.mrf.mxu1 }
 0x785   : > { %v1522_v47 = vpop.xlane.xlu1 %1521 }
 0x786   : > { %v1523_v48 = vmul.f32 %v1522_v47, %v1397_v7 }
 0x788   : > { %v1524_v49 = vsub.f32 %v1517_v44, %v1523_v48 }
 0x78a   : > { %v1525_v50 = vmul.f32 %v1524_v49, %v1524_v49 }
 0x78c   : > { %v1526_v51 = vsel %vm641_vm0, %v1525_v50, 0.0 }
 0x78d   : > { %1527 = vadd.xlane.f32.xlu2 %v1526_v51 }
 0x800   : > { %v1528_v52 = vpop.xlane.xlu2 %1527 }
 0x801   : > { %v1529_v53 = vmul.f32 %v1528_v52, %v1397_v7 }
 0x803   : > { %v1530_v54 = vadd.f32 1e-05, %v1529_v53 }
 0x805   : > { %1982 = vrsqrt.f32 %v1530_v54  ;;  %vm1537_vm10 = vweird.f32 %v1530_v54 }
 0x80b   : > { %v1983_v55 = vpop.eup %1982 }
 0x80c   : > { %v1532_v56 = vmul.f32 %v1983_v55, %v1530_v54  ;;  %vm1538_vm9 = vweird.f32 %v1983_v55 }
 0x80d   : > { %vm1539_vm11 = vmor %vm1537_vm10, %vm1538_vm9 }
 0x80e   : > { %v1533_v57 = vmul.f32 %v1983_v55, %v1532_v56 }
 0x810   : > { %v1534_v58 = vmul.f32 0.5, %v1533_v57 }
 0x812   : > { %v1535_v59 = vsub.f32 1.5, %v1534_v58 }
 0x814   : > { %v1536_v60 = vmul.f32 %v1983_v55, %v1535_v59 }
 0x816   : > { %v1540_v62 = vsel %vm1539_vm11, %v1983_v55, %v1536_v60 }
 0x817   : > { %v1541_v63 = vmul.f32 %v1540_v62, %v1524_v49 }
 0x819   : > { %v1545_v1 = vmul.f32 %v1960_v61, %v1541_v63 }
 0x81b   : > { %v1549_v2 = vadd.f32 %v1961_v0, %v1545_v1 }
 0x81d   : > { %1550 = vst.msk [vmem:[%s601_s29] sm:$0xff] %vm641_vm0, %v1549_v2 }
 0x81e   : > { %2011 = shalt.err (!%p2008_p5)
}
 0x81f   : > { %1887 = dma.vmem_to_hbm [thread:$0]  (%p2200_p4), %s1566_s30, 128, %s1568_s3, %s1552_s23  }
 0x820 PF: > { %s2559_s26 = sld [smem:[#allocation10_spill]] }
 0x821   : > { %s2560_s1 = sld [smem:[#allocation7_spill]] }
 0x826   : > { %p1893_p6 = scmp.ge.s32.totalorder %s2559_s26, 2 }
 0x827   : > { %s1579_s29 = sand.u32 1, %s2560_s1  }
 0x828   : > { %p1890_p7 = pnand %p1893_p6, %p2207_p8  ;;  %s1580_s17 = scalar_lea.sflag [#allocation5], %s1579_s29 }
 0x82a   : > { %p1891_p9 = pneg %p1890_p7 }
 0x82c   : > { %2037 = dma.done.wait (%p1891_p9), %s1580_s17, 128  }
 0x82d   : > { %2039 = vsyncadd (%p1891_p9), %s1580_s17, 4294967168  ;;  %s31_s19 = sadd.s32 1, %s2559_s26   ;;  %s2562_s0 = sld [smem:[#allocation8_spill]] }
 0x82e   : > { %p28_p10 = scmp.ge.s32.totalorder %s31_s19, 4   ;;  %s2563_s29 = sld [smem:[#allocation14_spill]] }
 0x82f   : > { %s2564_s30 = sld [smem:[#allocation9_spill]]  ;;  %s2566_s27 = smov %s2046_s28 }
 0x830   : > { %s2565_s3 = sld [smem:[#allocation11_spill]] }
 0x832   :  { %30 = sbr.rel (!%p28_p10) target bundleno = 10 (0xa), region = 167 }
 0x833   : > { %s2567_s28 = smov %s2562_s0 }
 0x836   : > { %s2568_s0 = smov %s2565_s3 }
 0x837   :  { %1586 = vsyncpa [#allocation5], 1 }
 0x838   :  { %1588 = vsyncpa [#allocation5 + $0x1], 1 }

</bundles_post_ra>
